<compile_context>
chip_gen: v5e
topology: v5e:2x2
jax: 0.10.0
libtpu: 0.0.40
codegen_flags: <defaults>
</compile_context>

<pallas_src>
import functools

import numpy as np
import jax
import jax.numpy as jnp
from jax.experimental import pallas as pl
from jax.experimental.pallas import tpu as pltpu

C_PAD = 128  # lane-dense channel padding


# ----------------------------------------------------------------------------
# Fused encoder kernel (one batch element per grid step).
# ----------------------------------------------------------------------------
def _make_encoder_kernel(n_layers):
    n_g = n_layers - 1  # layers that do in-kernel spatial gathering (1..n-1)

    def kernel(*refs):
        x_ref = refs[0]                                   # (1, M0, 128) bf16 im2col patches of layer 0
        s_refs = refs[1:1 + n_g]                          # (9, M_out, M_in) bf16 0/1 gathers
        w_refs = refs[1 + n_g:1 + n_g + n_layers]         # l0: (128,128); l>0: (9*128,128) bf16
        b_refs = refs[1 + n_g + n_layers:1 + n_g + 2 * n_layers]  # (1,128) f32
        o_ref = refs[-1]                                  # (1, M_final, 128) f32

        # ---- Layer 0: im2col was done in the wrapper -> one MXU matmul. ----
        acc = jnp.dot(x_ref[0], w_refs[0][...], preferred_element_type=jnp.float32)
        act = jnp.maximum(acc + b_refs[0][...], 0.0)      # f32, (M0, 128)

        # ---- Layers 1..n-1: gather 9 taps, concat along K, one matmul. -----
        for l in range(n_g):                              # static unroll over layers
            act_b = act.astype(jnp.bfloat16)
            taps = []
            for t in range(9):                            # static unroll over taps
                # 0/1 spatial gather (exact in bf16; one nonzero per row).
                tap = jnp.dot(s_refs[l][t], act_b,
                              preferred_element_type=jnp.float32)
                taps.append(tap.astype(jnp.bfloat16))
            patches = jnp.concatenate(taps, axis=1)       # (M_out, 9*128) bf16
            acc = jnp.dot(patches, w_refs[l + 1][...],
                          preferred_element_type=jnp.float32)
            act = jnp.maximum(acc + b_refs[l + 1][...], 0.0)

        o_ref[0] = act.astype(o_ref.dtype)

    return kernel


# ----------------------------------------------------------------------------
# Batch-independent 0/1 gather matrices for Conv2d(k=3, stride=2, padding=1)
# ----------------------------------------------------------------------------
@functools.lru_cache(maxsize=None)
def _selection_matrices(h, w):
    """Per-tap gather matrices, shape (9, ho*wo, h*w); zero rows = padding."""
    ho = (h + 2 - 3) // 2 + 1
    wo = (w + 2 - 3) // 2 + 1
    s = np.zeros((9, ho * wo, h * w), np.float32)
    for kh in range(3):
        for kw in range(3):
            t = kh * 3 + kw
            for i in range(ho):
                r = 2 * i + kh - 1
                if r < 0 or r >= h:
                    continue
                for j in range(wo):
                    c = 2 * j + kw - 1
                    if c < 0 or c >= w:
                        continue
                    s[t, i * wo + j, r * w + c] = 1.0
    return s, ho, wo


# ----------------------------------------------------------------------------
# Parameters
# ----------------------------------------------------------------------------
def init_encoder_params(key, in_channels=1, n_maps=32, out_channels=10, n_layers=4):
    """PyTorch-layout params: list of ((Cout, Cin, 3, 3) weight, (Cout,) bias)."""
    chans = [in_channels] + [n_maps] * (n_layers - 1) + [out_channels]
    params = []
    for li in range(n_layers):
        key, kw, kb = jax.random.split(key, 3)
        cin, cout = chans[li], chans[li + 1]
        wmat = 0.1 * jax.random.normal(kw, (cout, cin, 3, 3), jnp.float32)
        b = 0.01 * jax.random.normal(kb, (cout,), jnp.float32)
        params.append((wmat, b))
    return params


def prepare_encoder_params(params):
    """One-time weight/bias transform into the fused-kernel layout (bf16 weights).

    Layer 0: (Cout, Cin, 3, 3) -> (128, 128) with K = 9*Cin packed & zero-padded
             (consumes wrapper-built im2col patches).
    Layers 1..: per-tap channel-mix stacked along K -> (9*128, 128).
    Bias -> (1, 128) f32.
    """
    kparams = []
    for li, (wmat, b) in enumerate(params):
        cout, cin = int(wmat.shape[0]), int(wmat.shape[1])
        assert cout <= C_PAD and cin <= C_PAD
        wt = jnp.transpose(wmat, (2, 3, 1, 0))            # (3, 3, cin, cout)
        if li == 0:
            # TODO(synk): layer-0 im2col path assumes 9*cin <= 128 (true for cin=1).
            assert 9 * cin <= C_PAD
            wt = wt.reshape(9 * cin, cout)
            wt = jnp.pad(wt, ((0, C_PAD - 9 * cin), (0, C_PAD - cout)))
        else:
            wt = wt.reshape(9, cin, cout)
            wt = jnp.pad(wt, ((0, 0), (0, C_PAD - cin), (0, C_PAD - cout)))
            wt = wt.reshape(9 * C_PAD, C_PAD)
        bt = jnp.pad(b, (0, C_PAD - cout)).reshape(1, C_PAD).astype(jnp.float32)
        kparams.append((wt.astype(jnp.bfloat16), bt))
    out_channels = int(params[-1][0].shape[0])
    return kparams, out_channels


# ----------------------------------------------------------------------------
# Forward (mirrors EncoderLayer.forward; NCHW in, NCHW out)
# ----------------------------------------------------------------------------
@functools.partial(jax.jit, static_argnums=(2,))
def encoder_forward(x_nchw, kparams, out_channels):
    n, cin, h, w = x_nchw.shape
    n_layers = len(kparams)

    # Layer-0 im2col in the wrapper: layout plumbing on the input only.
    h0 = (h + 2 - 3) // 2 + 1
    w0 = (w + 2 - 3) // 2 + 1
    x_nhwc = jnp.transpose(x_nchw, (0, 2, 3, 1)).astype(jnp.float32)
    xp = jnp.pad(x_nhwc, ((0, 0), (1, 1), (1, 1), (0, 0)))
    cols = []
    for kh in range(3):
        for kw in range(3):
            cols.append(xp[:, kh::2, kw::2, :][:, :h0, :w0, :])
    patches0 = jnp.concatenate(cols, axis=-1).reshape(n, h0 * w0, 9 * cin)
    patches0 = jnp.pad(patches0, ((0, 0), (0, 0), (0, C_PAD - 9 * cin)))
    patches0 = patches0.astype(jnp.bfloat16)

    # Batch-independent 0/1 gather matrices for layers 1..n-1 (trace-time const).
    s_mats = []
    cur_h, cur_w = h0, w0
    for _ in range(n_layers - 1):
        s, cur_h, cur_w = _selection_matrices(cur_h, cur_w)
        s_mats.append(jnp.asarray(s, jnp.bfloat16))
    m_final = cur_h * cur_w

    ws = [p[0] for p in kparams]
    bs = [p[1] for p in kparams]

    out = pl.pallas_call(
        _make_encoder_kernel(n_layers),
        out_shape=jax.ShapeDtypeStruct((n, m_final, C_PAD), jnp.float32),
        grid=(n,),
        in_specs=(
            [pl.BlockSpec((1, h0 * w0, C_PAD), lambda b: (b, 0, 0))]
            + [pl.BlockSpec(s.shape, lambda b: (0, 0, 0)) for s in s_mats]
            + [pl.BlockSpec(wt.shape, lambda b: (0, 0)) for wt in ws]
            + [pl.BlockSpec(bt.shape, lambda b: (0, 0)) for bt in bs]
        ),
        out_specs=pl.BlockSpec((1, m_final, C_PAD), lambda b: (b, 0, 0)),
        compiler_params=pltpu.CompilerParams(
            dimension_semantics=("parallel",),
            vmem_limit_bytes=32 * 1024 * 1024,
        ),
    )(patches0, *s_mats, *ws, *bs)

    y = out[:, :, :out_channels].reshape(n, cur_h, cur_w, out_channels)
    return jnp.transpose(y, (0, 3, 1, 2))  # NHWC -> NCHW


# Plain-JAX f32 reference (in-script verification only)
def encoder_reference(x_nchw, params):
    x = jnp.transpose(x_nchw, (0, 2, 3, 1))
    for (wmat, b) in params:
        y = jax.lax.conv_general_dilated(
            x, wmat, window_strides=(2, 2), padding=((1, 1), (1, 1)),
            dimension_numbers=("NHWC", "OIHW", "NHWC"))
        x = jnp.maximum(y + b[None, None, None, :], 0.0)
    return jnp.transpose(x, (0, 3, 1, 2))


if __name__ == "__main__":
    key = jax.random.PRNGKey(0)
    key, kx = jax.random.split(key)

    # Shapes implied by the module defaults: batch=2, in_channels=1, 16x16.
    x = jax.random.normal(kx, (2, 1, 16, 16), jnp.float32)   # NCHW
    params = init_encoder_params(key)
    kparams, out_channels = prepare_encoder_params(params)

    out = encoder_forward(x, kparams, out_channels)
    out = jax.block_until_ready(out)
    assert out.shape == (2, 10, 1, 1), out.shape

    ref = encoder_reference(x, params)
    # bf16 operands (f32 accumulation) vs f32 reference -> looser tolerance.
    assert jnp.allclose(out, ref, rtol=5e-2, atol=3e-2), (
        "Pallas encoder output mismatch vs reference, max abs err = "
        + str(float(jnp.max(jnp.abs(out - ref)))))

    print("KERNEL_OK")
</pallas_src>

<mosaic_0001>
module attributes {stable_mosaic.version = 11 : i64} {
  func.func @kernel(%arg0: i32, %arg1: memref<1x64x128xbf16, #tpu.memory_space<vmem>>, %arg2: memref<9x16x64xbf16, #tpu.memory_space<vmem>>, %arg3: memref<9x4x16xbf16, #tpu.memory_space<vmem>>, %arg4: memref<9x1x4xbf16, #tpu.memory_space<vmem>>, %arg5: memref<128x128xbf16, #tpu.memory_space<vmem>>, %arg6: memref<1152x128xbf16, #tpu.memory_space<vmem>>, %arg7: memref<1152x128xbf16, #tpu.memory_space<vmem>>, %arg8: memref<1152x128xbf16, #tpu.memory_space<vmem>>, %arg9: memref<1x128xf32, #tpu.memory_space<vmem>>, %arg10: memref<1x128xf32, #tpu.memory_space<vmem>>, %arg11: memref<1x128xf32, #tpu.memory_space<vmem>>, %arg12: memref<1x128xf32, #tpu.memory_space<vmem>>, %arg13: memref<1x1x128xf32, #tpu.memory_space<vmem>>) attributes {dimension_semantics = [#tpu.dimension_semantics<parallel>], iteration_bounds = array<i64: 2>, scalar_prefetch = 0 : i64, scratch_operands = 0 : i64, tpu.core_type = #tpu.core_type<tc>, window_params = [{transform_indices = @transform_0, window_bounds = array<i64: 1, 64, 128>}, {pipeline_mode = #tpu.pipeline_mode<synchronous>, transform_indices = @transform_1, window_bounds = array<i64: 9, 16, 64>}, {pipeline_mode = #tpu.pipeline_mode<synchronous>, transform_indices = @transform_2, window_bounds = array<i64: 9, 4, 16>}, {pipeline_mode = #tpu.pipeline_mode<synchronous>, transform_indices = @transform_3, window_bounds = array<i64: 9, 1, 4>}, {pipeline_mode = #tpu.pipeline_mode<synchronous>, transform_indices = @transform_4, window_bounds = array<i64: 128, 128>}, {pipeline_mode = #tpu.pipeline_mode<synchronous>, transform_indices = @transform_5, window_bounds = array<i64: 1152, 128>}, {pipeline_mode = #tpu.pipeline_mode<synchronous>, transform_indices = @transform_6, window_bounds = array<i64: 1152, 128>}, {pipeline_mode = #tpu.pipeline_mode<synchronous>, transform_indices = @transform_7, window_bounds = array<i64: 1152, 128>}, {pipeline_mode = #tpu.pipeline_mode<synchronous>, transform_indices = @transform_8, window_bounds = array<i64: 1, 128>}, {pipeline_mode = #tpu.pipeline_mode<synchronous>, transform_indices = @transform_9, window_bounds = array<i64: 1, 128>}, {pipeline_mode = #tpu.pipeline_mode<synchronous>, transform_indices = @transform_10, window_bounds = array<i64: 1, 128>}, {pipeline_mode = #tpu.pipeline_mode<synchronous>, transform_indices = @transform_11, window_bounds = array<i64: 1, 128>}, {transform_indices = @transform_12, window_bounds = array<i64: 1, 1, 128>}]} {
    %c0 = arith.constant 0 : index
    %c0_0 = arith.constant 0 : index
    %c0_1 = arith.constant 0 : index
    %0 = vector.load %arg1[%c0, %c0_0, %c0_1] : memref<1x64x128xbf16, #tpu.memory_space<vmem>>, vector<1x64x128xbf16>
    %1 = vector.shape_cast %0 : vector<1x64x128xbf16> to vector<64x128xbf16>
    %c0_2 = arith.constant 0 : index
    %c0_3 = arith.constant 0 : index
    %2 = vector.load %arg5[%c0_2, %c0_3] : memref<128x128xbf16, #tpu.memory_space<vmem>>, vector<128x128xbf16>
    %cst = arith.constant dense<0.000000e+00> : vector<64x128xf32>
    %3 = tpu.matmul %1, %2, %cst {dimension_numbers = #tpu.dot_dimension_numbers<[1], [0], [0], [1], [0, 0, 1, 1], [], []>} : vector<64x128xbf16>, vector<128x128xbf16>, vector<64x128xf32> -> vector<64x128xf32>
    %c0_4 = arith.constant 0 : index
    %c0_5 = arith.constant 0 : index
    %4 = vector.load %arg9[%c0_4, %c0_5] : memref<1x128xf32, #tpu.memory_space<vmem>>, vector<1x128xf32>
    %5 = vector.broadcast %4 : vector<1x128xf32> to vector<64x128xf32>
    %6 = arith.addf %3, %5 : vector<64x128xf32>
    %cst_6 = arith.constant 0.000000e+00 : f32
    %7 = vector.broadcast %cst_6 : f32 to vector<64x128xf32>
    %8 = arith.maximumf %6, %7 : vector<64x128xf32>
    %9 = arith.truncf %8 : vector<64x128xf32> to vector<64x128xbf16>
    %c0_7 = arith.constant 0 : index
    %c0_8 = arith.constant 0 : index
    %c0_9 = arith.constant 0 : index
    %10 = vector.load %arg2[%c0_7, %c0_8, %c0_9] : memref<9x16x64xbf16, #tpu.memory_space<vmem>>, vector<1x16x64xbf16>
    %11 = vector.shape_cast %10 : vector<1x16x64xbf16> to vector<16x64xbf16>
    %cst_10 = arith.constant dense<0.000000e+00> : vector<16x128xf32>
    %12 = tpu.matmul %11, %9, %cst_10 {dimension_numbers = #tpu.dot_dimension_numbers<[1], [0], [0], [1], [0, 0, 1, 1], [], []>} : vector<16x64xbf16>, vector<64x128xbf16>, vector<16x128xf32> -> vector<16x128xf32>
    %13 = arith.truncf %12 : vector<16x128xf32> to vector<16x128xbf16>
    %c1 = arith.constant 1 : index
    %c0_11 = arith.constant 0 : index
    %c0_12 = arith.constant 0 : index
    %14 = vector.load %arg2[%c1, %c0_11, %c0_12] : memref<9x16x64xbf16, #tpu.memory_space<vmem>>, vector<1x16x64xbf16>
    %15 = vector.shape_cast %14 : vector<1x16x64xbf16> to vector<16x64xbf16>
    %cst_13 = arith.constant dense<0.000000e+00> : vector<16x128xf32>
    %16 = tpu.matmul %15, %9, %cst_13 {dimension_numbers = #tpu.dot_dimension_numbers<[1], [0], [0], [1], [0, 0, 1, 1], [], []>} : vector<16x64xbf16>, vector<64x128xbf16>, vector<16x128xf32> -> vector<16x128xf32>
    %17 = arith.truncf %16 : vector<16x128xf32> to vector<16x128xbf16>
    %c2 = arith.constant 2 : index
    %c0_14 = arith.constant 0 : index
    %c0_15 = arith.constant 0 : index
    %18 = vector.load %arg2[%c2, %c0_14, %c0_15] : memref<9x16x64xbf16, #tpu.memory_space<vmem>>, vector<1x16x64xbf16>
    %19 = vector.shape_cast %18 : vector<1x16x64xbf16> to vector<16x64xbf16>
    %cst_16 = arith.constant dense<0.000000e+00> : vector<16x128xf32>
    %20 = tpu.matmul %19, %9, %cst_16 {dimension_numbers = #tpu.dot_dimension_numbers<[1], [0], [0], [1], [0, 0, 1, 1], [], []>} : vector<16x64xbf16>, vector<64x128xbf16>, vector<16x128xf32> -> vector<16x128xf32>
    %21 = arith.truncf %20 : vector<16x128xf32> to vector<16x128xbf16>
    %c3 = arith.constant 3 : index
    %c0_17 = arith.constant 0 : index
    %c0_18 = arith.constant 0 : index
    %22 = vector.load %arg2[%c3, %c0_17, %c0_18] : memref<9x16x64xbf16, #tpu.memory_space<vmem>>, vector<1x16x64xbf16>
    %23 = vector.shape_cast %22 : vector<1x16x64xbf16> to vector<16x64xbf16>
    %cst_19 = arith.constant dense<0.000000e+00> : vector<16x128xf32>
    %24 = tpu.matmul %23, %9, %cst_19 {dimension_numbers = #tpu.dot_dimension_numbers<[1], [0], [0], [1], [0, 0, 1, 1], [], []>} : vector<16x64xbf16>, vector<64x128xbf16>, vector<16x128xf32> -> vector<16x128xf32>
    %25 = arith.truncf %24 : vector<16x128xf32> to vector<16x128xbf16>
    %c4 = arith.constant 4 : index
    %c0_20 = arith.constant 0 : index
    %c0_21 = arith.constant 0 : index
    %26 = vector.load %arg2[%c4, %c0_20, %c0_21] : memref<9x16x64xbf16, #tpu.memory_space<vmem>>, vector<1x16x64xbf16>
    %27 = vector.shape_cast %26 : vector<1x16x64xbf16> to vector<16x64xbf16>
    %cst_22 = arith.constant dense<0.000000e+00> : vector<16x128xf32>
    %28 = tpu.matmul %27, %9, %cst_22 {dimension_numbers = #tpu.dot_dimension_numbers<[1], [0], [0], [1], [0, 0, 1, 1], [], []>} : vector<16x64xbf16>, vector<64x128xbf16>, vector<16x128xf32> -> vector<16x128xf32>
    %29 = arith.truncf %28 : vector<16x128xf32> to vector<16x128xbf16>
    %c5 = arith.constant 5 : index
    %c0_23 = arith.constant 0 : index
    %c0_24 = arith.constant 0 : index
    %30 = vector.load %arg2[%c5, %c0_23, %c0_24] : memref<9x16x64xbf16, #tpu.memory_space<vmem>>, vector<1x16x64xbf16>
    %31 = vector.shape_cast %30 : vector<1x16x64xbf16> to vector<16x64xbf16>
    %cst_25 = arith.constant dense<0.000000e+00> : vector<16x128xf32>
    %32 = tpu.matmul %31, %9, %cst_25 {dimension_numbers = #tpu.dot_dimension_numbers<[1], [0], [0], [1], [0, 0, 1, 1], [], []>} : vector<16x64xbf16>, vector<64x128xbf16>, vector<16x128xf32> -> vector<16x128xf32>
    %33 = arith.truncf %32 : vector<16x128xf32> to vector<16x128xbf16>
    %c6 = arith.constant 6 : index
    %c0_26 = arith.constant 0 : index
    %c0_27 = arith.constant 0 : index
    %34 = vector.load %arg2[%c6, %c0_26, %c0_27] : memref<9x16x64xbf16, #tpu.memory_space<vmem>>, vector<1x16x64xbf16>
    %35 = vector.shape_cast %34 : vector<1x16x64xbf16> to vector<16x64xbf16>
    %cst_28 = arith.constant dense<0.000000e+00> : vector<16x128xf32>
    %36 = tpu.matmul %35, %9, %cst_28 {dimension_numbers = #tpu.dot_dimension_numbers<[1], [0], [0], [1], [0, 0, 1, 1], [], []>} : vector<16x64xbf16>, vector<64x128xbf16>, vector<16x128xf32> -> vector<16x128xf32>
    %37 = arith.truncf %36 : vector<16x128xf32> to vector<16x128xbf16>
    %c7 = arith.constant 7 : index
    %c0_29 = arith.constant 0 : index
    %c0_30 = arith.constant 0 : index
    %38 = vector.load %arg2[%c7, %c0_29, %c0_30] : memref<9x16x64xbf16, #tpu.memory_space<vmem>>, vector<1x16x64xbf16>
    %39 = vector.shape_cast %38 : vector<1x16x64xbf16> to vector<16x64xbf16>
    %cst_31 = arith.constant dense<0.000000e+00> : vector<16x128xf32>
    %40 = tpu.matmul %39, %9, %cst_31 {dimension_numbers = #tpu.dot_dimension_numbers<[1], [0], [0], [1], [0, 0, 1, 1], [], []>} : vector<16x64xbf16>, vector<64x128xbf16>, vector<16x128xf32> -> vector<16x128xf32>
    %41 = arith.truncf %40 : vector<16x128xf32> to vector<16x128xbf16>
    %c8 = arith.constant 8 : index
    %c0_32 = arith.constant 0 : index
    %c0_33 = arith.constant 0 : index
    %42 = vector.load %arg2[%c8, %c0_32, %c0_33] : memref<9x16x64xbf16, #tpu.memory_space<vmem>>, vector<1x16x64xbf16>
    %43 = vector.shape_cast %42 : vector<1x16x64xbf16> to vector<16x64xbf16>
    %cst_34 = arith.constant dense<0.000000e+00> : vector<16x128xf32>
    %44 = tpu.matmul %43, %9, %cst_34 {dimension_numbers = #tpu.dot_dimension_numbers<[1], [0], [0], [1], [0, 0, 1, 1], [], []>} : vector<16x64xbf16>, vector<64x128xbf16>, vector<16x128xf32> -> vector<16x128xf32>
    %45 = arith.truncf %44 : vector<16x128xf32> to vector<16x128xbf16>
    %46 = tpu.concatenate %13, %17, %21, %25, %29, %33, %37, %41, %45 in 1 : vector<16x128xbf16>, vector<16x128xbf16>, vector<16x128xbf16>, vector<16x128xbf16>, vector<16x128xbf16>, vector<16x128xbf16>, vector<16x128xbf16>, vector<16x128xbf16>, vector<16x128xbf16> -> vector<16x1152xbf16>
    %c0_35 = arith.constant 0 : index
    %c0_36 = arith.constant 0 : index
    %47 = vector.load %arg6[%c0_35, %c0_36] : memref<1152x128xbf16, #tpu.memory_space<vmem>>, vector<1152x128xbf16>
    %cst_37 = arith.constant dense<0.000000e+00> : vector<16x128xf32>
    %48 = tpu.matmul %46, %47, %cst_37 {dimension_numbers = #tpu.dot_dimension_numbers<[1], [0], [0], [1], [0, 0, 1, 1], [], []>} : vector<16x1152xbf16>, vector<1152x128xbf16>, vector<16x128xf32> -> vector<16x128xf32>
    %c0_38 = arith.constant 0 : index
    %c0_39 = arith.constant 0 : index
    %49 = vector.load %arg10[%c0_38, %c0_39] : memref<1x128xf32, #tpu.memory_space<vmem>>, vector<1x128xf32>
    %50 = vector.broadcast %49 : vector<1x128xf32> to vector<16x128xf32>
    %51 = arith.addf %48, %50 : vector<16x128xf32>
    %cst_40 = arith.constant 0.000000e+00 : f32
    %52 = vector.broadcast %cst_40 : f32 to vector<16x128xf32>
    %53 = arith.maximumf %51, %52 : vector<16x128xf32>
    %54 = arith.truncf %53 : vector<16x128xf32> to vector<16x128xbf16>
    %c0_41 = arith.constant 0 : index
    %c0_42 = arith.constant 0 : index
    %c0_43 = arith.constant 0 : index
    %55 = vector.load %arg3[%c0_41, %c0_42, %c0_43] : memref<9x4x16xbf16, #tpu.memory_space<vmem>>, vector<1x4x16xbf16>
    %56 = vector.shape_cast %55 : vector<1x4x16xbf16> to vector<4x16xbf16>
    %cst_44 = arith.constant dense<0.000000e+00> : vector<4x128xf32>
    %57 = tpu.matmul %56, %54, %cst_44 {dimension_numbers = #tpu.dot_dimension_numbers<[1], [0], [0], [1], [0, 0, 1, 1], [], []>} : vector<4x16xbf16>, vector<16x128xbf16>, vector<4x128xf32> -> vector<4x128xf32>
    %58 = arith.truncf %57 : vector<4x128xf32> to vector<4x128xbf16>
    %c1_45 = arith.constant 1 : index
    %c0_46 = arith.constant 0 : index
    %c0_47 = arith.constant 0 : index
    %59 = vector.load %arg3[%c1_45, %c0_46, %c0_47] : memref<9x4x16xbf16, #tpu.memory_space<vmem>>, vector<1x4x16xbf16>
    %60 = vector.shape_cast %59 : vector<1x4x16xbf16> to vector<4x16xbf16>
    %cst_48 = arith.constant dense<0.000000e+00> : vector<4x128xf32>
    %61 = tpu.matmul %60, %54, %cst_48 {dimension_numbers = #tpu.dot_dimension_numbers<[1], [0], [0], [1], [0, 0, 1, 1], [], []>} : vector<4x16xbf16>, vector<16x128xbf16>, vector<4x128xf32> -> vector<4x128xf32>
    %62 = arith.truncf %61 : vector<4x128xf32> to vector<4x128xbf16>
    %c2_49 = arith.constant 2 : index
    %c0_50 = arith.constant 0 : index
    %c0_51 = arith.constant 0 : index
    %63 = vector.load %arg3[%c2_49, %c0_50, %c0_51] : memref<9x4x16xbf16, #tpu.memory_space<vmem>>, vector<1x4x16xbf16>
    %64 = vector.shape_cast %63 : vector<1x4x16xbf16> to vector<4x16xbf16>
    %cst_52 = arith.constant dense<0.000000e+00> : vector<4x128xf32>
    %65 = tpu.matmul %64, %54, %cst_52 {dimension_numbers = #tpu.dot_dimension_numbers<[1], [0], [0], [1], [0, 0, 1, 1], [], []>} : vector<4x16xbf16>, vector<16x128xbf16>, vector<4x128xf32> -> vector<4x128xf32>
    %66 = arith.truncf %65 : vector<4x128xf32> to vector<4x128xbf16>
    %c3_53 = arith.constant 3 : index
    %c0_54 = arith.constant 0 : index
    %c0_55 = arith.constant 0 : index
    %67 = vector.load %arg3[%c3_53, %c0_54, %c0_55] : memref<9x4x16xbf16, #tpu.memory_space<vmem>>, vector<1x4x16xbf16>
    %68 = vector.shape_cast %67 : vector<1x4x16xbf16> to vector<4x16xbf16>
    %cst_56 = arith.constant dense<0.000000e+00> : vector<4x128xf32>
    %69 = tpu.matmul %68, %54, %cst_56 {dimension_numbers = #tpu.dot_dimension_numbers<[1], [0], [0], [1], [0, 0, 1, 1], [], []>} : vector<4x16xbf16>, vector<16x128xbf16>, vector<4x128xf32> -> vector<4x128xf32>
    %70 = arith.truncf %69 : vector<4x128xf32> to vector<4x128xbf16>
    %c4_57 = arith.constant 4 : index
    %c0_58 = arith.constant 0 : index
    %c0_59 = arith.constant 0 : index
    %71 = vector.load %arg3[%c4_57, %c0_58, %c0_59] : memref<9x4x16xbf16, #tpu.memory_space<vmem>>, vector<1x4x16xbf16>
    %72 = vector.shape_cast %71 : vector<1x4x16xbf16> to vector<4x16xbf16>
    %cst_60 = arith.constant dense<0.000000e+00> : vector<4x128xf32>
    %73 = tpu.matmul %72, %54, %cst_60 {dimension_numbers = #tpu.dot_dimension_numbers<[1], [0], [0], [1], [0, 0, 1, 1], [], []>} : vector<4x16xbf16>, vector<16x128xbf16>, vector<4x128xf32> -> vector<4x128xf32>
    %74 = arith.truncf %73 : vector<4x128xf32> to vector<4x128xbf16>
    %c5_61 = arith.constant 5 : index
    %c0_62 = arith.constant 0 : index
    %c0_63 = arith.constant 0 : index
    %75 = vector.load %arg3[%c5_61, %c0_62, %c0_63] : memref<9x4x16xbf16, #tpu.memory_space<vmem>>, vector<1x4x16xbf16>
    %76 = vector.shape_cast %75 : vector<1x4x16xbf16> to vector<4x16xbf16>
    %cst_64 = arith.constant dense<0.000000e+00> : vector<4x128xf32>
    %77 = tpu.matmul %76, %54, %cst_64 {dimension_numbers = #tpu.dot_dimension_numbers<[1], [0], [0], [1], [0, 0, 1, 1], [], []>} : vector<4x16xbf16>, vector<16x128xbf16>, vector<4x128xf32> -> vector<4x128xf32>
    %78 = arith.truncf %77 : vector<4x128xf32> to vector<4x128xbf16>
    %c6_65 = arith.constant 6 : index
    %c0_66 = arith.constant 0 : index
    %c0_67 = arith.constant 0 : index
    %79 = vector.load %arg3[%c6_65, %c0_66, %c0_67] : memref<9x4x16xbf16, #tpu.memory_space<vmem>>, vector<1x4x16xbf16>
    %80 = vector.shape_cast %79 : vector<1x4x16xbf16> to vector<4x16xbf16>
    %cst_68 = arith.constant dense<0.000000e+00> : vector<4x128xf32>
    %81 = tpu.matmul %80, %54, %cst_68 {dimension_numbers = #tpu.dot_dimension_numbers<[1], [0], [0], [1], [0, 0, 1, 1], [], []>} : vector<4x16xbf16>, vector<16x128xbf16>, vector<4x128xf32> -> vector<4x128xf32>
    %82 = arith.truncf %81 : vector<4x128xf32> to vector<4x128xbf16>
    %c7_69 = arith.constant 7 : index
    %c0_70 = arith.constant 0 : index
    %c0_71 = arith.constant 0 : index
    %83 = vector.load %arg3[%c7_69, %c0_70, %c0_71] : memref<9x4x16xbf16, #tpu.memory_space<vmem>>, vector<1x4x16xbf16>
    %84 = vector.shape_cast %83 : vector<1x4x16xbf16> to vector<4x16xbf16>
    %cst_72 = arith.constant dense<0.000000e+00> : vector<4x128xf32>
    %85 = tpu.matmul %84, %54, %cst_72 {dimension_numbers = #tpu.dot_dimension_numbers<[1], [0], [0], [1], [0, 0, 1, 1], [], []>} : vector<4x16xbf16>, vector<16x128xbf16>, vector<4x128xf32> -> vector<4x128xf32>
    %86 = arith.truncf %85 : vector<4x128xf32> to vector<4x128xbf16>
    %c8_73 = arith.constant 8 : index
    %c0_74 = arith.constant 0 : index
    %c0_75 = arith.constant 0 : index
    %87 = vector.load %arg3[%c8_73, %c0_74, %c0_75] : memref<9x4x16xbf16, #tpu.memory_space<vmem>>, vector<1x4x16xbf16>
    %88 = vector.shape_cast %87 : vector<1x4x16xbf16> to vector<4x16xbf16>
    %cst_76 = arith.constant dense<0.000000e+00> : vector<4x128xf32>
    %89 = tpu.matmul %88, %54, %cst_76 {dimension_numbers = #tpu.dot_dimension_numbers<[1], [0], [0], [1], [0, 0, 1, 1], [], []>} : vector<4x16xbf16>, vector<16x128xbf16>, vector<4x128xf32> -> vector<4x128xf32>
    %90 = arith.truncf %89 : vector<4x128xf32> to vector<4x128xbf16>
    %91 = tpu.concatenate %58, %62, %66, %70, %74, %78, %82, %86, %90 in 1 : vector<4x128xbf16>, vector<4x128xbf16>, vector<4x128xbf16>, vector<4x128xbf16>, vector<4x128xbf16>, vector<4x128xbf16>, vector<4x128xbf16>, vector<4x128xbf16>, vector<4x128xbf16> -> vector<4x1152xbf16>
    %c0_77 = arith.constant 0 : index
    %c0_78 = arith.constant 0 : index
    %92 = vector.load %arg7[%c0_77, %c0_78] : memref<1152x128xbf16, #tpu.memory_space<vmem>>, vector<1152x128xbf16>
    %cst_79 = arith.constant dense<0.000000e+00> : vector<4x128xf32>
    %93 = tpu.matmul %91, %92, %cst_79 {dimension_numbers = #tpu.dot_dimension_numbers<[1], [0], [0], [1], [0, 0, 1, 1], [], []>} : vector<4x1152xbf16>, vector<1152x128xbf16>, vector<4x128xf32> -> vector<4x128xf32>
    %c0_80 = arith.constant 0 : index
    %c0_81 = arith.constant 0 : index
    %94 = vector.load %arg11[%c0_80, %c0_81] : memref<1x128xf32, #tpu.memory_space<vmem>>, vector<1x128xf32>
    %95 = vector.broadcast %94 : vector<1x128xf32> to vector<4x128xf32>
    %96 = arith.addf %93, %95 : vector<4x128xf32>
    %cst_82 = arith.constant 0.000000e+00 : f32
    %97 = vector.broadcast %cst_82 : f32 to vector<4x128xf32>
    %98 = arith.maximumf %96, %97 : vector<4x128xf32>
    %99 = arith.truncf %98 : vector<4x128xf32> to vector<4x128xbf16>
    %c0_83 = arith.constant 0 : index
    %c0_84 = arith.constant 0 : index
    %c0_85 = arith.constant 0 : index
    %100 = vector.load %arg4[%c0_83, %c0_84, %c0_85] : memref<9x1x4xbf16, #tpu.memory_space<vmem>>, vector<1x1x4xbf16>
    %101 = vector.shape_cast %100 : vector<1x1x4xbf16> to vector<1x4xbf16>
    %cst_86 = arith.constant dense<0.000000e+00> : vector<1x128xf32>
    %102 = tpu.matmul %101, %99, %cst_86 {dimension_numbers = #tpu.dot_dimension_numbers<[1], [0], [0], [1], [0, 0, 1, 1], [], []>} : vector<1x4xbf16>, vector<4x128xbf16>, vector<1x128xf32> -> vector<1x128xf32>
    %103 = arith.truncf %102 : vector<1x128xf32> to vector<1x128xbf16>
    %c1_87 = arith.constant 1 : index
    %c0_88 = arith.constant 0 : index
    %c0_89 = arith.constant 0 : index
    %104 = vector.load %arg4[%c1_87, %c0_88, %c0_89] : memref<9x1x4xbf16, #tpu.memory_space<vmem>>, vector<1x1x4xbf16>
    %105 = vector.shape_cast %104 : vector<1x1x4xbf16> to vector<1x4xbf16>
    %cst_90 = arith.constant dense<0.000000e+00> : vector<1x128xf32>
    %106 = tpu.matmul %105, %99, %cst_90 {dimension_numbers = #tpu.dot_dimension_numbers<[1], [0], [0], [1], [0, 0, 1, 1], [], []>} : vector<1x4xbf16>, vector<4x128xbf16>, vector<1x128xf32> -> vector<1x128xf32>
    %107 = arith.truncf %106 : vector<1x128xf32> to vector<1x128xbf16>
    %c2_91 = arith.constant 2 : index
    %c0_92 = arith.constant 0 : index
    %c0_93 = arith.constant 0 : index
    %108 = vector.load %arg4[%c2_91, %c0_92, %c0_93] : memref<9x1x4xbf16, #tpu.memory_space<vmem>>, vector<1x1x4xbf16>
    %109 = vector.shape_cast %108 : vector<1x1x4xbf16> to vector<1x4xbf16>
    %cst_94 = arith.constant dense<0.000000e+00> : vector<1x128xf32>
    %110 = tpu.matmul %109, %99, %cst_94 {dimension_numbers = #tpu.dot_dimension_numbers<[1], [0], [0], [1], [0, 0, 1, 1], [], []>} : vector<1x4xbf16>, vector<4x128xbf16>, vector<1x128xf32> -> vector<1x128xf32>
    %111 = arith.truncf %110 : vector<1x128xf32> to vector<1x128xbf16>
    %c3_95 = arith.constant 3 : index
    %c0_96 = arith.constant 0 : index
    %c0_97 = arith.constant 0 : index
    %112 = vector.load %arg4[%c3_95, %c0_96, %c0_97] : memref<9x1x4xbf16, #tpu.memory_space<vmem>>, vector<1x1x4xbf16>
    %113 = vector.shape_cast %112 : vector<1x1x4xbf16> to vector<1x4xbf16>
    %cst_98 = arith.constant dense<0.000000e+00> : vector<1x128xf32>
    %114 = tpu.matmul %113, %99, %cst_98 {dimension_numbers = #tpu.dot_dimension_numbers<[1], [0], [0], [1], [0, 0, 1, 1], [], []>} : vector<1x4xbf16>, vector<4x128xbf16>, vector<1x128xf32> -> vector<1x128xf32>
    %115 = arith.truncf %114 : vector<1x128xf32> to vector<1x128xbf16>
    %c4_99 = arith.constant 4 : index
    %c0_100 = arith.constant 0 : index
    %c0_101 = arith.constant 0 : index
    %116 = vector.load %arg4[%c4_99, %c0_100, %c0_101] : memref<9x1x4xbf16, #tpu.memory_space<vmem>>, vector<1x1x4xbf16>
    %117 = vector.shape_cast %116 : vector<1x1x4xbf16> to vector<1x4xbf16>
    %cst_102 = arith.constant dense<0.000000e+00> : vector<1x128xf32>
    %118 = tpu.matmul %117, %99, %cst_102 {dimension_numbers = #tpu.dot_dimension_numbers<[1], [0], [0], [1], [0, 0, 1, 1], [], []>} : vector<1x4xbf16>, vector<4x128xbf16>, vector<1x128xf32> -> vector<1x128xf32>
    %119 = arith.truncf %118 : vector<1x128xf32> to vector<1x128xbf16>
    %c5_103 = arith.constant 5 : index
    %c0_104 = arith.constant 0 : index
    %c0_105 = arith.constant 0 : index
    %120 = vector.load %arg4[%c5_103, %c0_104, %c0_105] : memref<9x1x4xbf16, #tpu.memory_space<vmem>>, vector<1x1x4xbf16>
    %121 = vector.shape_cast %120 : vector<1x1x4xbf16> to vector<1x4xbf16>
    %cst_106 = arith.constant dense<0.000000e+00> : vector<1x128xf32>
    %122 = tpu.matmul %121, %99, %cst_106 {dimension_numbers = #tpu.dot_dimension_numbers<[1], [0], [0], [1], [0, 0, 1, 1], [], []>} : vector<1x4xbf16>, vector<4x128xbf16>, vector<1x128xf32> -> vector<1x128xf32>
    %123 = arith.truncf %122 : vector<1x128xf32> to vector<1x128xbf16>
    %c6_107 = arith.constant 6 : index
    %c0_108 = arith.constant 0 : index
    %c0_109 = arith.constant 0 : index
    %124 = vector.load %arg4[%c6_107, %c0_108, %c0_109] : memref<9x1x4xbf16, #tpu.memory_space<vmem>>, vector<1x1x4xbf16>
    %125 = vector.shape_cast %124 : vector<1x1x4xbf16> to vector<1x4xbf16>
    %cst_110 = arith.constant dense<0.000000e+00> : vector<1x128xf32>
    %126 = tpu.matmul %125, %99, %cst_110 {dimension_numbers = #tpu.dot_dimension_numbers<[1], [0], [0], [1], [0, 0, 1, 1], [], []>} : vector<1x4xbf16>, vector<4x128xbf16>, vector<1x128xf32> -> vector<1x128xf32>
    %127 = arith.truncf %126 : vector<1x128xf32> to vector<1x128xbf16>
    %c7_111 = arith.constant 7 : index
    %c0_112 = arith.constant 0 : index
    %c0_113 = arith.constant 0 : index
    %128 = vector.load %arg4[%c7_111, %c0_112, %c0_113] : memref<9x1x4xbf16, #tpu.memory_space<vmem>>, vector<1x1x4xbf16>
    %129 = vector.shape_cast %128 : vector<1x1x4xbf16> to vector<1x4xbf16>
    %cst_114 = arith.constant dense<0.000000e+00> : vector<1x128xf32>
    %130 = tpu.matmul %129, %99, %cst_114 {dimension_numbers = #tpu.dot_dimension_numbers<[1], [0], [0], [1], [0, 0, 1, 1], [], []>} : vector<1x4xbf16>, vector<4x128xbf16>, vector<1x128xf32> -> vector<1x128xf32>
    %131 = arith.truncf %130 : vector<1x128xf32> to vector<1x128xbf16>
    %c8_115 = arith.constant 8 : index
    %c0_116 = arith.constant 0 : index
    %c0_117 = arith.constant 0 : index
    %132 = vector.load %arg4[%c8_115, %c0_116, %c0_117] : memref<9x1x4xbf16, #tpu.memory_space<vmem>>, vector<1x1x4xbf16>
    %133 = vector.shape_cast %132 : vector<1x1x4xbf16> to vector<1x4xbf16>
    %cst_118 = arith.constant dense<0.000000e+00> : vector<1x128xf32>
    %134 = tpu.matmul %133, %99, %cst_118 {dimension_numbers = #tpu.dot_dimension_numbers<[1], [0], [0], [1], [0, 0, 1, 1], [], []>} : vector<1x4xbf16>, vector<4x128xbf16>, vector<1x128xf32> -> vector<1x128xf32>
    %135 = arith.truncf %134 : vector<1x128xf32> to vector<1x128xbf16>
    %136 = tpu.concatenate %103, %107, %111, %115, %119, %123, %127, %131, %135 in 1 : vector<1x128xbf16>, vector<1x128xbf16>, vector<1x128xbf16>, vector<1x128xbf16>, vector<1x128xbf16>, vector<1x128xbf16>, vector<1x128xbf16>, vector<1x128xbf16>, vector<1x128xbf16> -> vector<1x1152xbf16>
    %c0_119 = arith.constant 0 : index
    %c0_120 = arith.constant 0 : index
    %137 = vector.load %arg8[%c0_119, %c0_120] : memref<1152x128xbf16, #tpu.memory_space<vmem>>, vector<1152x128xbf16>
    %cst_121 = arith.constant dense<0.000000e+00> : vector<1x128xf32>
    %138 = tpu.matmul %136, %137, %cst_121 {dimension_numbers = #tpu.dot_dimension_numbers<[1], [0], [0], [1], [0, 0, 1, 1], [], []>} : vector<1x1152xbf16>, vector<1152x128xbf16>, vector<1x128xf32> -> vector<1x128xf32>
    %c0_122 = arith.constant 0 : index
    %c0_123 = arith.constant 0 : index
    %139 = vector.load %arg12[%c0_122, %c0_123] : memref<1x128xf32, #tpu.memory_space<vmem>>, vector<1x128xf32>
    %140 = arith.addf %138, %139 : vector<1x128xf32>
    %cst_124 = arith.constant 0.000000e+00 : f32
    %141 = vector.broadcast %cst_124 : f32 to vector<1x128xf32>
    %142 = arith.maximumf %140, %141 : vector<1x128xf32>
    %c0_125 = arith.constant 0 : index
    %c0_126 = arith.constant 0 : index
    %c0_127 = arith.constant 0 : index
    %143 = vector.load %arg13[%c0_125, %c0_126, %c0_127] : memref<1x1x128xf32, #tpu.memory_space<vmem>>, vector<1x1x128xf32>
    %144 = vector.shape_cast %143 : vector<1x1x128xf32> to vector<1x128xf32>
    %145 = vector.shape_cast %142 : vector<1x128xf32> to vector<1x1x128xf32>
    tpu.vector_store %arg13[%c0_125, %c0_126, %c0_127], %145 {strides = array<i32>} : memref<1x1x128xf32, #tpu.memory_space<vmem>>, vector<1x1x128xf32>,
    return
  }
  func.func @transform_0(%arg0: i32) -> (i32, i32, i32) {
    %c0_i32 = arith.constant 0 : i32
    %c0_i32_0 = arith.constant 0 : i32
    %c0_i32_1 = arith.constant 0 : i32
    return %arg0, %c0_i32, %c0_i32_0 : i32, i32, i32
  }
  func.func @transform_1(%arg0: i32) -> (i32, i32, i32) {
    %c0_i32 = arith.constant 0 : i32
    %c0_i32_0 = arith.constant 0 : i32
    %c0_i32_1 = arith.constant 0 : i32
    %c0_i32_2 = arith.constant 0 : i32
    return %c0_i32, %c0_i32_0, %c0_i32_1 : i32, i32, i32
  }
  func.func @transform_2(%arg0: i32) -> (i32, i32, i32) {
    %c0_i32 = arith.constant 0 : i32
    %c0_i32_0 = arith.constant 0 : i32
    %c0_i32_1 = arith.constant 0 : i32
    %c0_i32_2 = arith.constant 0 : i32
    return %c0_i32, %c0_i32_0, %c0_i32_1 : i32, i32, i32
  }
  func.func @transform_3(%arg0: i32) -> (i32, i32, i32) {
    %c0_i32 = arith.constant 0 : i32
    %c0_i32_0 = arith.constant 0 : i32
    %c0_i32_1 = arith.constant 0 : i32
    %c0_i32_2 = arith.constant 0 : i32
    return %c0_i32, %c0_i32_0, %c0_i32_1 : i32, i32, i32
  }
  func.func @transform_4(%arg0: i32) -> (i32, i32) {
    %c0_i32 = arith.constant 0 : i32
    %c0_i32_0 = arith.constant 0 : i32
    %c0_i32_1 = arith.constant 0 : i32
    return %c0_i32, %c0_i32_0 : i32, i32
  }
  func.func @transform_5(%arg0: i32) -> (i32, i32) {
    %c0_i32 = arith.constant 0 : i32
    %c0_i32_0 = arith.constant 0 : i32
    %c0_i32_1 = arith.constant 0 : i32
    return %c0_i32, %c0_i32_0 : i32, i32
  }
  func.func @transform_6(%arg0: i32) -> (i32, i32) {
    %c0_i32 = arith.constant 0 : i32
    %c0_i32_0 = arith.constant 0 : i32
    %c0_i32_1 = arith.constant 0 : i32
    return %c0_i32, %c0_i32_0 : i32, i32
  }
  func.func @transform_7(%arg0: i32) -> (i32, i32) {
    %c0_i32 = arith.constant 0 : i32
    %c0_i32_0 = arith.constant 0 : i32
    %c0_i32_1 = arith.constant 0 : i32
    return %c0_i32, %c0_i32_0 : i32, i32
  }
  func.func @transform_8(%arg0: i32) -> (i32, i32) {
    %c0_i32 = arith.constant 0 : i32
    %c0_i32_0 = arith.constant 0 : i32
    %c0_i32_1 = arith.constant 0 : i32
    return %c0_i32, %c0_i32_0 : i32, i32
  }
  func.func @transform_9(%arg0: i32) -> (i32, i32) {
    %c0_i32 = arith.constant 0 : i32
    %c0_i32_0 = arith.constant 0 : i32
    %c0_i32_1 = arith.constant 0 : i32
    return %c0_i32, %c0_i32_0 : i32, i32
  }
  func.func @transform_10(%arg0: i32) -> (i32, i32) {
    %c0_i32 = arith.constant 0 : i32
    %c0_i32_0 = arith.constant 0 : i32
    %c0_i32_1 = arith.constant 0 : i32
    return %c0_i32, %c0_i32_0 : i32, i32
  }
  func.func @transform_11(%arg0: i32) -> (i32, i32) {
    %c0_i32 = arith.constant 0 : i32
    %c0_i32_0 = arith.constant 0 : i32
    %c0_i32_1 = arith.constant 0 : i32
    return %c0_i32, %c0_i32_0 : i32, i32
  }
  func.func @transform_12(%arg0: i32) -> (i32, i32, i32) {
    %c0_i32 = arith.constant 0 : i32
    %c0_i32_0 = arith.constant 0 : i32
    %c0_i32_1 = arith.constant 0 : i32
    return %arg0, %c0_i32, %c0_i32_0 : i32, i32, i32
  }
}

</mosaic_0001>

<bundles_post_ra>
// kernel: encoder_forward.1
= control target key start
LH: loop header
LB: loop body
LE: loop exit
PB: predicated region body
PF: predicated region fallthrough
CT: control target
= control target key end

     0   :  { %s5565_s0 = inlined_call_operand.vmem [shape: bf16[2,64,128], index: 0, kind: input, shape index: {}]   ;;  %s5566_s1 = inlined_call_operand.vmem [shape: bf16[9,16,64], index: 1, kind: input, shape index: {}]   ;;  %s5567_s2 = inlined_call_operand.hbm [shape: bf16[9,4,16], index: 2, kind: input, shape index: {}]   ;;  %s5568_s3 = inlined_call_operand.hbm [shape: bf16[9,1,4], index: 3, kind: input, shape index: {}]   ;;  %s5569_s4 = inlined_call_operand.vmem [shape: bf16[128,128], index: 4, kind: input, shape index: {}]   ;;  %s5570_s5 = inlined_call_operand.vmem [shape: bf16[1152,128], index: 5, kind: input, shape index: {}]   ;;  %s5571_s6 = inlined_call_operand.hbm [shape: bf16[1152,128], index: 6, kind: input, shape index: {}]   ;;  %s5572_s7 = inlined_call_operand.hbm [shape: bf16[1152,128], index: 7, kind: input, shape index: {}]   ;;  %s5573_s8 = inlined_call_operand.vmem [shape: f32[1,128], index: 8, kind: input, shape index: {}]   ;;  %s5574_s9 = inlined_call_operand.hbm [shape: f32[1,128], index: 9, kind: input, shape index: {}]   ;;  %s5575_s10 = inlined_call_operand.hbm [shape: f32[1,128], index: 10, kind: input, shape index: {}]   ;;  %s5576_s11 = inlined_call_operand.hbm [shape: f32[1,128], index: 11, kind: input, shape index: {}]   ;;  %s5577_s12 = inlined_call_operand.vmem [shape: f32[2,1,128], index: 12, kind: output, shape index: {}]  }
   0x1   :  { %5578 = sst [smem:[#allocation17_spill]] %s5567_s2 }
   0x2   :  { %5579 = sst [smem:[#allocation18_spill]] %s5568_s3 }
   0x3   :  { %5580 = sst [smem:[#allocation19_spill]] %s5572_s7 }
   0x4   :  { %17 = vsyncpa [#allocation3], 0 }
   0x5   :  { %18 = vsyncpa [#allocation5], 0 }
   0x6   :  { %19 = vsyncpa [#allocation8], 0 }
   0x7   :  { %20 = vsyncpa [#allocation11], 0  ;;  %s5177_s21 = smov 0  }
   0x8 LB: > { %s5581_s3 = sld [smem:[#allocation18_spill]]  ;;  %s5186_s25 = sadd.s32 4294967295, %s5097_s21   ;;  %s5097_s21 = sphi %s5177_s21, %s26_s21  }
   0x9   : > { %p3527_p0 = scmp.ge.s32.totalorder %s5097_s21, 1  ;;  %p314_p1 = scmp.lt.s32.totalorder %s5097_s21, 3 }
   0xa   : > { %p4827_p2 = scmp.eq.s32.totalorder %s5186_s25, 0  ;;  %s5099_s27 = smov [#allocation4]  }
   0xb   : > { %p5191_p3 = pnand %p3527_p0, %p314_p1  ;;  %s344_s28 = sshll.u32 %s5099_s27, 4  ;;  %s345_s28 = int_to_ptr.vmem [resolvable:$true] %s344_s28 }
   0xc   : > { %s5584_s7 = sld [smem:[#allocation19_spill]]  ;;  %s5100_s15 = smov [#allocation7]  }
   0xd   : > { %p4805_p4 = pneg %p5191_p3  ;;  %s378_s16 = sshll.u32 %s5100_s15, 4  ;;  %s379_s16 = int_to_ptr.vmem [resolvable:$true] %s378_s16 }
   0xe   : > { %s342_s24 = sshll.u32 %s5581_s3, 4  ;;  %s5101_s17 = smov 16   ;;  %s343_s24 = int_to_ptr.hbm [resolvable:$true] %s342_s24 }
   0xf   : > { %p5199_p5 = pnand %p4827_p2, %p4805_p4  ;;  %s5102_s18 = smov 1  }
  0x10   : > { %s406_s22 = sshll.u32 %s5575_s10, 4  ;;  %s5103_s23 = smov 64   ;;  %s407_s22 = int_to_ptr.hbm [resolvable:$true] %s406_s22 }
  0x11   : > { %4811 = dma.hbm_to_vmem [thread:$0]  (!%p5199_p5), %s343_s24, 144, %s345_s28, [#allocation5], %s5101_s17, %s5101_s17, %s5102_s18  }
  0x12   : > { %s376_s14 = sshll.u32 %s5584_s7, 4  ;;  %s5104_s27 = smov 4   ;;  %s377_s14 = int_to_ptr.hbm [resolvable:$true] %s376_s14 }
  0x13   : > { %4817 = dma.hbm_to_vmem [thread:$0]  (!%p5199_p5), %s377_s14, 9216, %s379_s16, [#allocation8], %s5103_s23, %s5103_s23, %s5104_s27  }
  0x14   : > { %s5105_s30 = smov [#allocation10]   ;;  %s5585_s2 = sld [smem:[#allocation17_spill]] }
  0x15   : > { %s408_s13 = sshll.u32 %s5105_s30, 4  ;;  %s5106_s24 = smov [#allocation2]   ;;  %s409_s13 = int_to_ptr.vmem [resolvable:$true] %s408_s13 }
  0x16   : > { %4823 = dma.hbm_to_vmem [thread:$0]  (!%p5199_p5), %s407_s22, 16, %s409_s13, [#allocation11]  }
  0x17   : > { %s330_s28 = sshll.u32 %s5106_s24, 4  ;;  %s362_s19 = sshll.u32 %s5571_s6, 4  ;;  %s331_s28 = int_to_ptr.vmem [resolvable:$true] %s330_s28  ;;  %s363_s19 = int_to_ptr.hbm [resolvable:$true] %s362_s19 }
  0x18   : > { %s5107_s14 = smov 32   ;;  %s5108_s16 = smov 2  }
  0x19   : > { %s5109_s3 = smov [#allocation6]   ;;  %s394_s22 = sshll.u32 %s5574_s9, 4  ;;  %s395_s22 = int_to_ptr.hbm [resolvable:$true] %s394_s22 }
  0x1a   : > { %s328_s15 = sshll.u32 %s5585_s2, 4  ;;  %s364_s7 = sshll.u32 %s5109_s3, 4  ;;  %s329_s15 = int_to_ptr.hbm [resolvable:$true] %s328_s15  ;;  %s365_s7 = int_to_ptr.vmem [resolvable:$true] %s364_s7 }
  0x1b   : > { %4808 = dma.hbm_to_vmem [thread:$0]  (!%p5199_p5), %s329_s15, 288, %s331_s28, [#allocation3], %s5107_s14, %s5107_s14, %s5108_s16  }
  0x1c   : > { %4814 = dma.hbm_to_vmem [thread:$0]  (!%p5199_p5), %s363_s19, 9216, %s365_s7, [#allocation5], %s5103_s23, %s5103_s23, %s5104_s27  }
  0x1d   : > { %s418_s17 = sshll.u32 %s5576_s11, 4  ;;  %s5110_s18 = smov [#allocation9]   ;;  %s419_s17 = int_to_ptr.hbm [resolvable:$true] %s418_s17 }
  0x1e   : > { %s396_s2 = sshll.u32 %s5110_s18, 4  ;;  %s5111_s15 = smov [#allocation12]   ;;  %s397_s2 = int_to_ptr.vmem [resolvable:$true] %s396_s2 }
  0x1f   : > { %4820 = dma.hbm_to_vmem [thread:$0]  (!%p5199_p5), %s395_s22, 16, %s397_s2, [#allocation8]  }
  0x20   : > { %s420_s28 = sshll.u32 %s5111_s15, 4  ;;  %441 = sbr.rel (%p5191_p3) target bundleno = 1220 (0x4c4), region = 68  ;;  %s421_s28 = int_to_ptr.vmem [resolvable:$true] %s420_s28 }
  0x21   : > { %4826 = dma.hbm_to_vmem [thread:$0]  (!%p5199_p5), %s419_s17, 16, %s421_s28, [#allocation11]  }
  0x25   : > { %5080 = dma.done.wait (%p4827_p2), [#allocation3], 288  }
  0x26   : > { %5082 = vsyncadd (%p4827_p2), [#allocation3], 4294967008 }
  0x27   : > { %5084 = dma.done.wait (%p4827_p2), [#allocation5], 9360  }
  0x28   : > { %5086 = vsyncadd (%p4827_p2), [#allocation5], 4294957936 }
  0x29   : > { %5088 = dma.done.wait (%p4827_p2), [#allocation8], 9232  }
  0x2a   : > { %5090 = vsyncadd (%p4827_p2), [#allocation8], 4294958064 }
  0x2b   : > { %5092 = dma.done.wait (%p4827_p2), [#allocation11], 32  }
  0x2c   : > { %5094 = vsyncadd (%p4827_p2), [#allocation11], 4294967264  ;;  %v4551_v0 = vld [vmem:[%s5569_s4 + $0x38] sm:$0xff]  ;;  %v4550_v1 = vld [vmem:[%s5569_s4 + $0x30] sm:$0xff]  ;;  %p512_p6 = scmp.lt.s32.totalorder %s5186_s25, 1  ;;  %vm669_vm0 = vcmask 523264  }
  0x2d   : > { %621 = vmatpush.bf16.msra.mxu0 %v4551_v0  ;;  %v4549_v2 = vld [vmem:[%s5569_s4 + $0x28] sm:$0xff]  ;;  %v4548_v3 = vld [vmem:[%s5569_s4 + $0x20] sm:$0xff]  ;;  %v4547_v4 = vld [vmem:[%s5569_s4 + $0x18] sm:$0xff]  ;;  %vm1669_vm1 = vcmask 130048   ;;  %vm2543_vm2 = vcmask 1041408   ;;  %vm2539_vm3 = vcmask 31744  }
  0x2e   : > { %v4546_v5 = vld [vmem:[%s5569_s4 + $0x10] sm:$0xff]  ;;  %s5587_s25 = smov (!%p512_p6, %s5186_s25), 1  ;;  %v4545_v6 = vld [vmem:[%s5569_s4 + $0x8] sm:$0xff]  ;;  %v4544_v7 = vld [vmem:[%s5569_s4] sm:$0xff] }
  0x2f   : > { %s4539_s24 = sshll.u32 %s5587_s25, 5  ;;  %v4862_v19 = vld [vmem:[%s5573_s8] ss:$0 sm:$0xff]  ;;  %v4553_v42 = vld [vmem:[%s5566_s1 + $0x8] sm:$0xff]  ;;  %v4554_v43 = vld [vmem:[%s5566_s1 + $0x10] sm:$0xff]  ;;  %s519_s17 = scalar_lea.vmem %s5577_s12, %s5587_s25 }
  0x30   : > { %s516_s2 = scalar_lea.vmem %s5565_s0, %s4539_s24  ;;  %v4552_v41 = vld [vmem:[%s5566_s1] sm:$0xff]  ;;  %v4555_v44 = vld [vmem:[%s5566_s1 + $0x18] sm:$0xff]  ;;  %v4557_v46 = vld [vmem:[%s5566_s1 + $0x28] sm:$0xff] }
  0x31   : > { %622 = vmatpush.bf16.msra.mxu0 %v4550_v1  ;;  %v4540_v8 = vld [vmem:[%s516_s2] sm:$0xff]  ;;  %v4541_v9 = vld [vmem:[%s516_s2 + $0x8] sm:$0xff]  ;;  %v4542_v10 = vld [vmem:[%s516_s2 + $0x10] sm:$0xff] }
  0x32   : > { %v4543_v11 = vld [vmem:[%s516_s2 + $0x18] sm:$0xff]  ;;  %v4556_v45 = vld [vmem:[%s5566_s1 + $0x20] sm:$0xff]  ;;  %v4591_v51 = vld [vmem:[%s5570_s5 + $0xf0] sm:$0xff] }
  0x33   : > { %v4592_v47 = vld [vmem:[%s5570_s5 + $0xf8] sm:$0xff]  ;;  %v4567_v52 = vld [vmem:[%s5570_s5 + $0x30] sm:$0xff]  ;;  %v4560_v57 = vld [vmem:[%s5566_s1 + $0x40] sm:$0xff] }
  0x34   : > { %v4568_v48 = vld [vmem:[%s5570_s5 + $0x38] sm:$0xff]  ;;  %v4575_v53 = vld [vmem:[%s5570_s5 + $0x70] sm:$0xff]  ;;  %v4566_v58 = vld [vmem:[%s5570_s5 + $0x28] sm:$0xff] }
  0x35   : > { %623 = vmatpush.bf16.msra.mxu0 %v4549_v2  ;;  %v4576_v49 = vld [vmem:[%s5570_s5 + $0x78] sm:$0xff]  ;;  %v4583_v54 = vld [vmem:[%s5570_s5 + $0xb0] sm:$0xff]  ;;  %v4574_v59 = vld [vmem:[%s5570_s5 + $0x68] sm:$0xff] }
  0x36   : > { %v4584_v50 = vld [vmem:[%s5570_s5 + $0xb8] sm:$0xff]  ;;  %v4558_v55 = vld [vmem:[%s5566_s1 + $0x30] sm:$0xff]  ;;  %v4582_v60 = vld [vmem:[%s5570_s5 + $0xa8] sm:$0xff] }
  0x37   : > { %v4559_v56 = vld [vmem:[%s5566_s1 + $0x38] sm:$0xff]  ;;  %v4565_v61 = vld [vmem:[%s5570_s5 + $0x20] sm:$0xff]  ;;  %v4563_v2 = vld [vmem:[%s5570_s5 + $0x10] sm:$0xff] }
  0x38   : > { %v4573_v62 = vld [vmem:[%s5570_s5 + $0x60] sm:$0xff]  ;;  %v4564_v0 = vld [vmem:[%s5570_s5 + $0x18] sm:$0xff] }
  0x39   : > { %624 = vmatpush.bf16.msra.mxu0 %v4548_v3  ;;  %v4581_v63 = vld [vmem:[%s5570_s5 + $0xa0] sm:$0xff]  ;;  %v4572_v1 = vld [vmem:[%s5570_s5 + $0x58] sm:$0xff]  ;;  %v4571_v3 = vld [vmem:[%s5570_s5 + $0x50] sm:$0xff] }
  0x3d   : > { %625 = vmatpush.bf16.msra.mxu0 %v4547_v4  ;;  %v4562_v4 = vld [vmem:[%s5570_s5 + $0x8] sm:$0xff] }
  0x41   : > { %626 = vmatpush.bf16.msra.mxu0 %v4546_v5  ;;  %v4561_v5 = vld [vmem:[%s5570_s5] sm:$0xff] }
  0x45   : > { %627 = vmatpush.bf16.msra.mxu0 %v4545_v6  ;;  %v4600_v6 = vld [vmem:[%s5570_s5 + $0x138] sm:$0xff] }
  0x49   : > { %628 = vmatpush.bf16.msra.mxu0 %v4544_v7  ;;  %v4599_v7 = vld [vmem:[%s5570_s5 + $0x130] sm:$0xff] }
  0x4c   : > { %629 = vmatmul.bf16.vlgmr.msra.gmra.mxu0 %v4540_v8  ;;  %v4570_v8 = vld [vmem:[%s5570_s5 + $0x48] sm:$0xff] }
  0x4d   : > { %1581 = vmatpush.bf16.msrb.mxu0 %v4592_v47 }
  0x51   : > { %1582 = vmatpush.bf16.msrb.mxu0 %v4591_v51 }
  0x5c   : > { %634 = vmatmul.bf16.gmra.mxu0 %v4541_v9  ;;  %v4590_v9 = vld [vmem:[%s5570_s5 + $0xe8] sm:$0xff] }
  0x5d   : > { %1583 = vmatpush.bf16.msrb.mxu0 %v4590_v9 }
  0x6c   : > { %639 = vmatmul.bf16.gmra.mxu0 %v4542_v10  ;;  %v4598_v10 = vld [vmem:[%s5570_s5 + $0x128] sm:$0xff] }
  0x7c   : > { %644 = vmatmul.bf16.gmra.mxu0 %v4543_v11  ;;  %v4580_v11 = vld [vmem:[%s5570_s5 + $0x98] sm:$0xff] }
  0xc9   : > { %v630_v12 = vpop.f32.mrf.mxu0 }
  0xca   : > { %v631_v35 = vadd.f32 %v4862_v19, %v630_v12  ;;  %v4569_v12 = vld [vmem:[%s5570_s5 + $0x40] sm:$0xff] }
  0xcc   : > { %v650_v39 = vmax.f32 %v631_v35, 0.0  ;;  %v4603_v35 = vld [vmem:[%s5570_s5 + $0x150] sm:$0xff] }
  0xd1   : > { %v632_v13 = vpop.f32.mrf.mxu0 }
  0xd2   : > { %v633_v32 = vadd.f32 %v4862_v19, %v632_v13  ;;  %v4589_v13 = vld [vmem:[%s5570_s5 + $0xe0] sm:$0xff] }
  0xd3   : > { %1584 = vmatpush.bf16.msrb.mxu0 %v4589_v13 }
  0xd4   : > { %v651_v37 = vmax.f32 %v633_v32, 0.0  ;;  %v4604_v32 = vld [vmem:[%s5570_s5 + $0x158] sm:$0xff] }
  0xd6   : > { %v658_v40 = vpack.c.bf16 %v651_v37, %v650_v39  ;;  %v4613_v37 = vld [vmem:[%s5570_s5 + $0x1a0] sm:$0xff]  ;;  %v4622_v39 = vld [vmem:[%s5570_s5 + $0x1e8] sm:$0xff] }
  0xd9   : > { %v635_v14 = vpop.f32.mrf.mxu0 }
  0xda   : > { %v636_v30 = vadd.f32 %v4862_v19, %v635_v14  ;;  %v4597_v14 = vld [vmem:[%s5570_s5 + $0x120] sm:$0xff] }
  0xdc   : > { %v652_v36 = vmax.f32 %v636_v30, 0.0  ;;  %v4585_v30 = vld [vmem:[%s5570_s5 + $0xc0] sm:$0xff] }
  0xe1   : > { %v637_v15 = vpop.f32.mrf.mxu0 }
  0xe2   : > { %v638_v27 = vadd.f32 %v4862_v19, %v637_v15  ;;  %v4608_v15 = vld [vmem:[%s5570_s5 + $0x178] sm:$0xff] }
  0xe4   : > { %v653_v33 = vmax.f32 %v638_v27, 0.0  ;;  %v4594_v27 = vld [vmem:[%s5570_s5 + $0x108] sm:$0xff] }
  0xe6   : > { %v659_v38 = vpack.c.bf16 %v653_v33, %v652_v36  ;;  %v4624_v33 = vld [vmem:[%s5570_s5 + $0x1f8] sm:$0xff]  ;;  %v4623_v36 = vld [vmem:[%s5570_s5 + $0x1f0] sm:$0xff] }
  0xe9   : > { %v640_v16 = vpop.f32.mrf.mxu0 }
  0xea   : > { %v641_v24 = vadd.f32 %v4862_v19, %v640_v16  ;;  %v4579_v16 = vld [vmem:[%s5570_s5 + $0x90] sm:$0xff] }
  0xec   : > { %v654_v31 = vmax.f32 %v641_v24, 0.0  ;;  %v4577_v24 = vld [vmem:[%s5570_s5 + $0x80] sm:$0xff] }
  0xf1   : > { %v642_v17 = vpop.f32.mrf.mxu0 }
  0xf2   : > { %v643_v22 = vadd.f32 %v4862_v19, %v642_v17  ;;  %v4588_v17 = vld [vmem:[%s5570_s5 + $0xd8] sm:$0xff] }
  0xf3   : > { %1585 = vmatpush.bf16.msrb.mxu0 %v4588_v17 }
  0xf4   : > { %v655_v28 = vmax.f32 %v643_v22, 0.0  ;;  %v4595_v22 = vld [vmem:[%s5570_s5 + $0x110] sm:$0xff] }
  0xf6   : > { %v660_v34 = vpack.c.bf16 %v655_v28, %v654_v31  ;;  %v4605_v28 = vld [vmem:[%s5570_s5 + $0x160] sm:$0xff] }
  0xf7   : > { %v4593_v31 = vld [vmem:[%s5570_s5 + $0x100] sm:$0xff] }
  0xf9   : > { %v645_v18 = vpop.f32.mrf.mxu0 }
  0xfa   : > { %v646_v20 = vadd.f32 %v4862_v19, %v645_v18  ;;  %v4596_v18 = vld [vmem:[%s5570_s5 + $0x118] sm:$0xff] }
  0xfc   : > { %v656_v25 = vmax.f32 %v646_v20, 0.0  ;;  %v4578_v20 = vld [vmem:[%s5570_s5 + $0x88] sm:$0xff] }
 0x101   : > { %v647_v21 = vpop.f32.mrf.mxu0 }
 0x102   : > { %v648_v23 = vadd.f32 %v4862_v19, %v647_v21  ;;  %v4607_v19 = vld [vmem:[%s5570_s5 + $0x170] sm:$0xff] }
 0x103   : > { %v4587_v21 = vld [vmem:[%s5570_s5 + $0xd0] sm:$0xff] }
 0x104   : > { %v657_v26 = vmax.f32 %v648_v23, 0.0  ;;  %v4606_v23 = vld [vmem:[%s5570_s5 + $0x168] sm:$0xff]  ;;  %1586 = vmatpush.bf16.msrb.mxu0 %v4587_v21 }
 0x106   : > { %v661_v29 = vpack.c.bf16 %v657_v26, %v656_v25  ;;  %v4616_v25 = vld [vmem:[%s5570_s5 + $0x1b8] sm:$0xff]  ;;  %v4586_v26 = vld [vmem:[%s5570_s5 + $0xc8] sm:$0xff] }
 0x108   : > { %677 = vmatpush.bf16.msra.mxu1 %v661_v29  ;;  %704 = vmatpush.bf16.msra.mxu2 %v661_v29 }
 0x109   : > { %731 = vmatpush.bf16.msra.mxu3 %v661_v29  ;;  %1587 = vmatpush.bf16.msrb.mxu0 %v4586_v26 }
 0x10c   : > { %678 = vmatpush.bf16.msra.mxu1 %v660_v34  ;;  %705 = vmatpush.bf16.msra.mxu2 %v660_v34 }
 0x10d   : > { %732 = vmatpush.bf16.msra.mxu3 %v660_v34  ;;  %1588 = vmatpush.bf16.msrb.mxu0 %v4585_v30 }
 0x110   : > { %679 = vmatpush.bf16.msra.mxu1 %v659_v38  ;;  %706 = vmatpush.bf16.msra.mxu2 %v659_v38 }
 0x111   : > { %733 = vmatpush.bf16.msra.mxu3 %v659_v38  ;;  %1637 = vmatpush.bf16.msra.mxu0 %v4624_v33  ;;  %v4626_v33 = vld [vmem:[%s5570_s5 + $0x208] sm:$0xff] }
 0x114   : > { %680 = vmatpush.bf16.msra.mxu1 %v658_v40  ;;  %707 = vmatpush.bf16.msra.mxu2 %v658_v40 }
 0x115   : > { %734 = vmatpush.bf16.msra.mxu3 %v658_v40  ;;  %1638 = vmatpush.bf16.msra.mxu0 %v4623_v36 }
 0x117   : > { %3598 = vmatmul.msk.bf16.vlgmr.msra.gmra.mxu1 %vm669_vm0, %v4552_v41  ;;  %3605 = vmatmul.msk.bf16.vlgmr.msra.gmra.mxu2 %vm669_vm0, %v4553_v42  ;;  %v4612_v41 = vld [vmem:[%s5570_s5 + $0x198] sm:$0xff]  ;;  %v4601_v42 = vld [vmem:[%s5570_s5 + $0x140] sm:$0xff] }
 0x118   : > { %758 = vmatpush.bf16.msrb.mxu1 %v661_v29  ;;  %785 = vmatpush.bf16.msrb.mxu2 %v661_v29 }
 0x119   : > { %812 = vmatpush.bf16.msrb.mxu3 %v661_v29  ;;  %1639 = vmatpush.bf16.msra.mxu0 %v4622_v39  ;;  %v4625_v39 = vld [vmem:[%s5570_s5 + $0x200] sm:$0xff] }
 0x11a   : > { %3612 = vmatmul.msk.bf16.vlgmr.msra.gmra.mxu3 %vm669_vm0, %v4554_v43  ;;  %v4621_v43 = vld [vmem:[%s5570_s5 + $0x1e0] sm:$0xff] }
 0x11c   : > { %759 = vmatpush.bf16.msrb.mxu1 %v660_v34  ;;  %786 = vmatpush.bf16.msrb.mxu2 %v660_v34 }
 0x11d   : > { %813 = vmatpush.bf16.msrb.mxu3 %v660_v34  ;;  %1640 = vmatpush.bf16.msra.mxu0 %v4621_v43 }
 0x120   : > { %760 = vmatpush.bf16.msrb.mxu1 %v659_v38  ;;  %787 = vmatpush.bf16.msrb.mxu2 %v659_v38 }
 0x121   : > { %814 = vmatpush.bf16.msrb.mxu3 %v659_v38 }
 0x124   : > { %761 = vmatpush.bf16.msrb.mxu1 %v658_v40  ;;  %788 = vmatpush.bf16.msrb.mxu2 %v658_v40 }
 0x125   : > { %815 = vmatpush.bf16.msrb.mxu3 %v658_v40 }
 0x127   : > { %3619 = vmatmul.msk.bf16.vlgmr.msrb.gmra.mxu1 %vm669_vm0, %v4555_v44  ;;  %3626 = vmatmul.msk.bf16.vlgmr.msrb.gmra.mxu2 %vm669_vm0, %v4556_v45  ;;  %v4611_v44 = vld [vmem:[%s5570_s5 + $0x190] sm:$0xff] }
 0x128   : > { %839 = vmatpush.bf16.msra.mxu1 %v661_v29  ;;  %866 = vmatpush.bf16.msra.mxu2 %v661_v29 }
 0x129   : > { %893 = vmatpush.bf16.msra.mxu3 %v661_v29  ;;  %v4615_v29 = vld [vmem:[%s5570_s5 + $0x1b0] sm:$0xff] }
 0x12a   : > { %3633 = vmatmul.msk.bf16.vlgmr.msrb.gmra.mxu3 %vm669_vm0, %v4557_v46  ;;  %v4620_v46 = vld [vmem:[%s5570_s5 + $0x1d8] sm:$0xff] }
 0x12b   : > { %1641 = vmatpush.bf16.msra.mxu0 %v4620_v46 }
 0x12c   : > { %840 = vmatpush.bf16.msra.mxu1 %v660_v34  ;;  %867 = vmatpush.bf16.msra.mxu2 %v660_v34 }
 0x12d   : > { %894 = vmatpush.bf16.msra.mxu3 %v660_v34  ;;  %v4614_v34 = vld [vmem:[%s5570_s5 + $0x1a8] sm:$0xff] }
 0x130   : > { %841 = vmatpush.bf16.msra.mxu1 %v659_v38  ;;  %868 = vmatpush.bf16.msra.mxu2 %v659_v38 }
 0x131   : > { %895 = vmatpush.bf16.msra.mxu3 %v659_v38  ;;  %v4602_v38 = vld [vmem:[%s5570_s5 + $0x148] sm:$0xff] }
 0x134   : > { %842 = vmatpush.bf16.msra.mxu1 %v658_v40  ;;  %869 = vmatpush.bf16.msra.mxu2 %v658_v40 }
 0x135   : > { %896 = vmatpush.bf16.msra.mxu3 %v658_v40 }
 0x137   : > { %3640 = vmatmul.msk.bf16.vlgmr.msra.gmra.mxu1 %vm669_vm0, %v4558_v55  ;;  %3647 = vmatmul.msk.bf16.vlgmr.msra.gmra.mxu2 %vm669_vm0, %v4559_v56  ;;  %v4632_v55 = vld [vmem:[%s5570_s5 + $0x238] sm:$0xff]  ;;  %v4609_v56 = vld [vmem:[%s5570_s5 + $0x180] sm:$0xff] }
 0x138   : > { %1539 = vmatpush.bf16.msrb.mxu1 %v4568_v48  ;;  %1553 = vmatpush.bf16.msrb.mxu2 %v4576_v49 }
 0x139   : > { %1567 = vmatpush.bf16.msrb.mxu3 %v4584_v50  ;;  %v4610_v50 = vld [vmem:[%s5570_s5 + $0x188] sm:$0xff] }
 0x13a   : > { %3654 = vmatmul.msk.bf16.vlgmr.msra.gmra.mxu3 %vm669_vm0, %v4560_v57 }
 0x13c   : > { %1540 = vmatpush.bf16.msrb.mxu1 %v4567_v52  ;;  %1554 = vmatpush.bf16.msrb.mxu2 %v4575_v53  ;;  %v4619_v52 = vld [vmem:[%s5570_s5 + $0x1d0] sm:$0xff] }
 0x13d   : > { %1568 = vmatpush.bf16.msrb.mxu3 %v4583_v54  ;;  %1642 = vmatpush.bf16.msra.mxu0 %v4619_v52 }
 0x140   : > { %1541 = vmatpush.bf16.msrb.mxu1 %v4566_v58  ;;  %1555 = vmatpush.bf16.msrb.mxu2 %v4574_v59 }
 0x141   : > { %1569 = vmatpush.bf16.msrb.mxu3 %v4582_v60 }
 0x144   : > { %1542 = vmatpush.bf16.msrb.mxu1 %v4565_v61  ;;  %1556 = vmatpush.bf16.msrb.mxu2 %v4573_v62  ;;  %v4618_v61 = vld [vmem:[%s5570_s5 + $0x1c8] sm:$0xff] }
 0x145   : > { %1570 = vmatpush.bf16.msrb.mxu3 %v4581_v63  ;;  %1643 = vmatpush.bf16.msra.mxu0 %v4618_v61  ;;  %v4863_v61 = vld [vmem:[#allocation9] ss:$0 sm:$0xff] }
 0x148   : > { %1543 = vmatpush.bf16.msrb.mxu1 %v4564_v0  ;;  %1557 = vmatpush.bf16.msrb.mxu2 %v4572_v1  ;;  %v4631_v1 = vld [vmem:[%s5570_s5 + $0x230] sm:$0xff] }
 0x149   : > { %1571 = vmatpush.bf16.msrb.mxu3 %v4580_v11 }
 0x14c   : > { %1544 = vmatpush.bf16.msrb.mxu1 %v4563_v2  ;;  %1558 = vmatpush.bf16.msrb.mxu2 %v4571_v3 }
 0x14d   : > { %1572 = vmatpush.bf16.msrb.mxu3 %v4579_v16 }
 0x150   : > { %1545 = vmatpush.bf16.msrb.mxu1 %v4562_v4  ;;  %1559 = vmatpush.bf16.msrb.mxu2 %v4570_v8 }
 0x151   : > { %1573 = vmatpush.bf16.msrb.mxu3 %v4578_v20 }
 0x154   : > { %1546 = vmatpush.bf16.msrb.mxu1 %v4561_v5  ;;  %1560 = vmatpush.bf16.msrb.mxu2 %v4569_v12 }
 0x155   : > { %1574 = vmatpush.bf16.msrb.mxu3 %v4577_v24 }
 0x158   : > { %1595 = vmatpush.bf16.msra.mxu1 %v4600_v6  ;;  %1609 = vmatpush.bf16.msra.mxu2 %v4608_v15 }
 0x159   : > { %1623 = vmatpush.bf16.msra.mxu3 %v4616_v25  ;;  %v4627_v25 = vld [vmem:[%s5570_s5 + $0x210] sm:$0xff] }
 0x15c   : > { %1596 = vmatpush.bf16.msra.mxu1 %v4599_v7  ;;  %1610 = vmatpush.bf16.msra.mxu2 %v4607_v19  ;;  %v4617_v7 = vld [vmem:[%s5570_s5 + $0x1c0] sm:$0xff]  ;;  %v4628_v19 = vld [vmem:[%s5570_s5 + $0x218] sm:$0xff] }
 0x15d   : > { %1624 = vmatpush.bf16.msra.mxu3 %v4615_v29  ;;  %1644 = vmatpush.bf16.msra.mxu0 %v4617_v7 }
 0x160   : > { %1597 = vmatpush.bf16.msra.mxu1 %v4598_v10  ;;  %1611 = vmatpush.bf16.msra.mxu2 %v4606_v23  ;;  %v4630_v10 = vld [vmem:[%s5570_s5 + $0x228] sm:$0xff] }
 0x161   : > { %1625 = vmatpush.bf16.msra.mxu3 %v4614_v34 }
 0x164   : > { %1598 = vmatpush.bf16.msra.mxu1 %v4597_v14  ;;  %1612 = vmatpush.bf16.msra.mxu2 %v4605_v28  ;;  %v4629_v14 = vld [vmem:[%s5570_s5 + $0x220] sm:$0xff] }
 0x165   : > { %1626 = vmatpush.bf16.msra.mxu3 %v4613_v37 }
 0x168   : > { %1599 = vmatpush.bf16.msra.mxu1 %v4596_v18  ;;  %1613 = vmatpush.bf16.msra.mxu2 %v4604_v32 }
 0x169   : > { %1627 = vmatpush.bf16.msra.mxu3 %v4612_v41 }
 0x16c   : > { %1600 = vmatpush.bf16.msra.mxu1 %v4595_v22  ;;  %1614 = vmatpush.bf16.msra.mxu2 %v4603_v35 }
 0x16d   : > { %1628 = vmatpush.bf16.msra.mxu3 %v4611_v44 }
 0x170   : > { %1601 = vmatpush.bf16.msra.mxu1 %v4594_v27  ;;  %1615 = vmatpush.bf16.msra.mxu2 %v4602_v38 }
 0x171   : > { %1629 = vmatpush.bf16.msra.mxu3 %v4610_v50 }
 0x174   : > { %1602 = vmatpush.bf16.msra.mxu1 %v4593_v31  ;;  %1616 = vmatpush.bf16.msra.mxu2 %v4601_v42 }
 0x175   : > { %1630 = vmatpush.bf16.msra.mxu3 %v4609_v56 }
 0x194   : > { %v682_v40 = vpop.f32.mrf.mxu1 }
 0x195   : > { %v687_v47 = vpack.c.bf16 %v682_v40, %v682_v40 }
 0x197   : > { %v907_v53 = vunpack.c.l.b16 %v687_v47 }
 0x19a   : > { %v709_v45 = vpop.f32.mrf.mxu2 }
 0x19b   : > { %v714_v57 = vpack.c.bf16 %v709_v45, %v709_v45 }
 0x19c   : > { %v684_v49 = vpop.f32.mrf.mxu1 }
 0x19d   : > { %v736_v48 = vpop.f32.mrf.mxu3  ;;  %v688_v51 = vpack.c.bf16 %v684_v49, %v684_v49  ;;  %v913_v2 = vunpack.c.l.b16 %v714_v57 }
 0x19e   : > { %v741_v59 = vpack.c.bf16 %v736_v48, %v736_v48 }
 0x19f   : > { %v908_v54 = vunpack.c.l.b16 %v688_v51 }
 0x1a0   : > { %v919_v5 = vunpack.c.l.b16 %v741_v59 }
 0x1a1   : > { %v909_v58 = vpack.c.b16 %v908_v54, %v907_v53 }
 0x1a2   : > { %v711_v60 = vpop.f32.mrf.mxu2 }
 0x1a3   : > { %v715_v62 = vpack.c.bf16 %v711_v60, %v711_v60  ;;  %1547 = vmatmul.bf16.vlgmr.msrb.gmra.mxu1 %v909_v58 }
 0x1a4   : > { %1651 = vmatpush.bf16.msrb.mxu1 %v4632_v55  ;;  %v763_v4 = vpop.f32.mrf.mxu1 }
 0x1a5   : > { %v738_v63 = vpop.f32.mrf.mxu3  ;;  %v914_v3 = vunpack.c.l.b16 %v715_v62  ;;  %v768_v11 = vpack.c.bf16 %v763_v4, %v763_v4 }
 0x1a6   : > { %v742_v0 = vpack.c.bf16 %v738_v63, %v738_v63 }
 0x1a7   : > { %v915_v8 = vpack.c.b16 %v914_v3, %v913_v2  ;;  %v925_v17 = vunpack.c.l.b16 %v768_v11 }
 0x1a8   : > { %v920_v6 = vunpack.c.l.b16 %v742_v0  ;;  %1652 = vmatpush.bf16.msrb.mxu1 %v4631_v1 }
 0x1a9   : > { %1561 = vmatmul.bf16.vlgmr.msrb.gmra.mxu2 %v915_v8 }
 0x1aa   : > { %v921_v9 = vpack.c.b16 %v920_v6, %v919_v5  ;;  %v790_v12 = vpop.f32.mrf.mxu2 }
 0x1ab   : > { %v795_v21 = vpack.c.bf16 %v790_v12, %v790_v12 }
 0x1ac   : > { %1575 = vmatmul.bf16.vlgmr.msrb.gmra.mxu3 %v921_v9  ;;  %1653 = vmatpush.bf16.msrb.mxu1 %v4630_v10  ;;  %v765_v15 = vpop.f32.mrf.mxu1 }
 0x1ad   : > { %v817_v13 = vpop.f32.mrf.mxu3  ;;  %v769_v16 = vpack.c.bf16 %v765_v15, %v765_v15  ;;  %v931_v29 = vunpack.c.l.b16 %v795_v21 }
 0x1ae   : > { %v822_v22 = vpack.c.bf16 %v817_v13, %v817_v13 }
 0x1af   : > { %v926_v18 = vunpack.c.l.b16 %v769_v16 }
 0x1b0   : > { %1654 = vmatpush.bf16.msrb.mxu1 %v4629_v14  ;;  %v937_v30 = vunpack.c.l.b16 %v822_v22 }
 0x1b1   : > { %v927_v20 = vpack.c.b16 %v926_v18, %v925_v17 }
 0x1b2   : > { %v792_v23 = vpop.f32.mrf.mxu2 }
 0x1b3   : > { %1589 = vmatmul.bf16.vlgmr.msrb.gmra.mxu0 %v927_v20  ;;  %v796_v26 = vpack.c.bf16 %v792_v23, %v792_v23 }
 0x1b4   : > { %1655 = vmatpush.bf16.msrb.mxu1 %v4628_v19  ;;  %v844_v28 = vpop.f32.mrf.mxu1 }
 0x1b5   : > { %v819_v24 = vpop.f32.mrf.mxu3  ;;  %v932_v31 = vunpack.c.l.b16 %v796_v26  ;;  %v849_v36 = vpack.c.bf16 %v844_v28, %v844_v28 }
 0x1b6   : > { %v823_v27 = vpack.c.bf16 %v819_v24, %v819_v24 }
 0x1b7   : > { %v933_v34 = vpack.c.b16 %v932_v31, %v931_v29  ;;  %v943_v42 = vunpack.c.l.b16 %v849_v36  ;;  %v1783_v36 = vld [vmem:[#allocation2 + $0xc] sm:$0x3] }
 0x1b8   : > { %v938_v32 = vunpack.c.l.b16 %v823_v27  ;;  %1656 = vmatpush.bf16.msrb.mxu1 %v4627_v25 }
 0x1b9   : > { %1603 = vmatmul.bf16.vlgmr.msra.gmra.mxu1 %v933_v34  ;;  %v1688_v34 = vld [vmem:[#allocation2 + $0x2] sm:$0x3] }
 0x1ba   : > { %v939_v35 = vpack.c.b16 %v938_v32, %v937_v30  ;;  %v871_v37 = vpop.f32.mrf.mxu2 }
 0x1bb   : > { %v876_v45 = vpack.c.bf16 %v871_v37, %v871_v37  ;;  %v4640_v37 = vld [vmem:[#allocation6 + $0x38] sm:$0xff] }
 0x1bc   : > { %1617 = vmatmul.bf16.vlgmr.msra.gmra.mxu2 %v939_v35  ;;  %1657 = vmatpush.bf16.msrb.mxu1 %v4626_v33  ;;  %v846_v40 = vpop.f32.mrf.mxu1  ;;  %v1668_v33 = vld [vmem:[#allocation2] sm:$0x3]  ;;  %v1707_v35 = vld [vmem:[#allocation2 + $0x4] sm:$0x3] }
 0x1bd   : > { %v898_v38 = vpop.f32.mrf.mxu3  ;;  %v850_v41 = vpack.c.bf16 %v846_v40, %v846_v40  ;;  %v949_v51 = vunpack.c.l.b16 %v876_v45  ;;  %v4647_v40 = vld [vmem:[#allocation6 + $0x70] sm:$0xff]  ;;  %v4656_v45 = vld [vmem:[#allocation6 + $0xb8] sm:$0xff] }
 0x1be   : > { %v903_v46 = vpack.c.bf16 %v898_v38, %v898_v38  ;;  %v4639_v38 = vld [vmem:[#allocation6 + $0x30] sm:$0xff] }
 0x1bf   : > { %v944_v43 = vunpack.c.l.b16 %v850_v41  ;;  %v4638_v41 = vld [vmem:[#allocation6 + $0x28] sm:$0xff] }
 0x1c0   : > { %1658 = vmatpush.bf16.msrb.mxu1 %v4625_v39  ;;  %v955_v52 = vunpack.c.l.b16 %v903_v46  ;;  %v4648_v39 = vld [vmem:[#allocation6 + $0x78] sm:$0xff]  ;;  %v1745_v46 = vld [vmem:[#allocation2 + $0x8] sm:$0x3] }
 0x1c1   : > { %v945_v44 = vpack.c.b16 %v944_v43, %v943_v42  ;;  %v4646_v42 = vld [vmem:[#allocation6 + $0x68] sm:$0xff]  ;;  %v4637_v43 = vld [vmem:[#allocation6 + $0x20] sm:$0xff] }
 0x1c2   : > { %v873_v47 = vpop.f32.mrf.mxu2 }
 0x1c3   : > { %1631 = vmatmul.bf16.vlgmr.msra.gmra.mxu3 %v945_v44  ;;  %v877_v49 = vpack.c.bf16 %v873_v47, %v873_v47  ;;  %v1726_v44 = vld [vmem:[#allocation2 + $0x6] sm:$0x3]  ;;  %v4664_v47 = vld [vmem:[#allocation6 + $0xf8] sm:$0xff] }
 0x1c5   : > { %v900_v48 = vpop.f32.mrf.mxu3  ;;  %v950_v53 = vunpack.c.l.b16 %v877_v49  ;;  %v4636_v49 = vld [vmem:[#allocation6 + $0x18] sm:$0xff] }
 0x1c6   : > { %v904_v50 = vpack.c.bf16 %v900_v48, %v900_v48  ;;  %v1764_v48 = vld [vmem:[#allocation2 + $0xa] sm:$0x3] }
 0x1c7   : > { %v951_v55 = vpack.c.b16 %v950_v53, %v949_v51  ;;  %v4655_v51 = vld [vmem:[#allocation6 + $0xb0] sm:$0xff] }
 0x1c8   : > { %v956_v54 = vunpack.c.l.b16 %v904_v50  ;;  %v4645_v50 = vld [vmem:[#allocation6 + $0x60] sm:$0xff]  ;;  %v4635_v53 = vld [vmem:[#allocation6 + $0x10] sm:$0xff] }
 0x1c9   : > { %1645 = vmatmul.bf16.vlgmr.msra.gmra.mxu0 %v951_v55  ;;  %v4654_v55 = vld [vmem:[#allocation6 + $0xa8] sm:$0xff] }
 0x1ca   : > { %v957_v56 = vpack.c.b16 %v956_v54, %v955_v52  ;;  %v4663_v52 = vld [vmem:[#allocation6 + $0xf0] sm:$0xff]  ;;  %v4644_v54 = vld [vmem:[#allocation6 + $0x58] sm:$0xff] }
 0x1cc   : > { %1659 = vmatmul.bf16.vlgmr.msrb.gmra.mxu1 %v957_v56  ;;  %v4662_v56 = vld [vmem:[#allocation6 + $0xe8] sm:$0xff] }
 0x220   : > { %v1548_v57 = vpop.f32.mrf.mxu1 }
 0x221   : > { %v1549_v1 = vadd.f32 %v4863_v61, %v1548_v57  ;;  %v4634_v57 = vld [vmem:[#allocation6 + $0x8] sm:$0xff] }
 0x228   : > { %v1550_v59 = vpop.f32.mrf.mxu1 }
 0x229   : > { %v1551_v4 = vadd.f32 %v4863_v61, %v1550_v59  ;;  %v4653_v59 = vld [vmem:[#allocation6 + $0xa0] sm:$0xff] }
 0x22a   : > { %v4633_v61 = vld [vmem:[#allocation6] sm:$0xff] }
 0x22c   : > { %v1562_v58 = vpop.f32.mrf.mxu2 }
 0x22d   : > { %v1563_v2 = vadd.f32 %v1562_v58, %v1549_v1  ;;  %v4643_v58 = vld [vmem:[#allocation6 + $0x50] sm:$0xff]  ;;  %v4652_v1 = vld [vmem:[#allocation6 + $0x98] sm:$0xff] }
 0x22f   : > { %v1576_v60 = vpop.f32.mrf.mxu3 }
 0x230   : > { %v1590_v62 = vpop.f32.mrf.mxu0  ;;  %v1577_v5 = vadd.f32 %v1576_v60, %v1563_v2  ;;  %v4661_v60 = vld [vmem:[#allocation6 + $0xe0] sm:$0xff]  ;;  %v1821_v2 = vld [vmem:[#allocation2 + $0x10] sm:$0x3] }
 0x232   : > { %v1591_v10 = vadd.f32 %v1590_v62, %v1577_v5  ;;  %v4642_v62 = vld [vmem:[#allocation6 + $0x48] sm:$0xff]  ;;  %v4671_v5 = vld [vmem:[#allocation6 + $0x130] sm:$0xff] }
 0x234   : > { %v1564_v63 = vpop.f32.mrf.mxu2 }
 0x235   : > { %v1565_v9 = vadd.f32 %v1564_v63, %v1551_v4  ;;  %v4672_v63 = vld [vmem:[#allocation6 + $0x138] sm:$0xff]  ;;  %v4641_v4 = vld [vmem:[#allocation6 + $0x40] sm:$0xff] }
 0x236   : > { %v1604_v0 = vpop.f32.mrf.mxu1 }
 0x237   : > { %v1578_v3 = vpop.f32.mrf.mxu3  ;;  %v1605_v12 = vadd.f32 %v1604_v0, %v1591_v10  ;;  %v1802_v0 = vld [vmem:[#allocation2 + $0xe] sm:$0x3]  ;;  %v4669_v10 = vld [vmem:[#allocation6 + $0x120] sm:$0xff] }
 0x238   : > { %v1592_v6 = vpop.f32.mrf.mxu0  ;;  %v1579_v11 = vadd.f32 %v1578_v3, %v1565_v9  ;;  %v4660_v3 = vld [vmem:[#allocation6 + $0xd8] sm:$0xff]  ;;  %v4650_v9 = vld [vmem:[#allocation6 + $0x88] sm:$0xff] }
 0x23a   : > { %v1593_v17 = vadd.f32 %v1592_v6, %v1579_v11  ;;  %v4651_v6 = vld [vmem:[#allocation6 + $0x90] sm:$0xff]  ;;  %v4649_v11 = vld [vmem:[#allocation6 + $0x80] sm:$0xff] }
 0x23e   : > { %v1606_v7 = vpop.f32.mrf.mxu1 }
 0x23f   : > { %v1618_v8 = vpop.f32.mrf.mxu2  ;;  %v1607_v20 = vadd.f32 %v1606_v7, %v1593_v17  ;;  %v4659_v7 = vld [vmem:[#allocation6 + $0xd0] sm:$0xff]  ;;  %v4658_v17 = vld [vmem:[#allocation6 + $0xc8] sm:$0xff] }
 0x240   : > { %v1619_v14 = vadd.f32 %v1618_v8, %v1605_v12  ;;  %v4670_v8 = vld [vmem:[#allocation6 + $0x128] sm:$0xff]  ;;  %v4688_v12 = vld [vmem:[#allocation6 + $0x1b8] sm:$0xff] }
 0x246   : > { %v1632_v13 = vpop.f32.mrf.mxu3  ;;  %v1646_v15 = vpop.f32.mrf.mxu0 }
 0x247   : > { %v1633_v18 = vadd.f32 %v1632_v13, %v1619_v14  ;;  %v1620_v19 = vpop.f32.mrf.mxu2  ;;  %v4668_v13 = vld [vmem:[#allocation6 + $0x118] sm:$0xff]  ;;  %v4667_v14 = vld [vmem:[#allocation6 + $0x110] sm:$0xff] }
 0x248   : > { %v1621_v21 = vadd.f32 %v1620_v19, %v1607_v20  ;;  %v4679_v19 = vld [vmem:[#allocation6 + $0x170] sm:$0xff]  ;;  %v4686_v20 = vld [vmem:[#allocation6 + $0x1a8] sm:$0xff] }
 0x249   : > { %v1660_v16 = vpop.f32.mrf.mxu1  ;;  %v1647_v22 = vadd.f32 %v1646_v15, %v1633_v18  ;;  %v4680_v15 = vld [vmem:[#allocation6 + $0x178] sm:$0xff]  ;;  %v4666_v18 = vld [vmem:[#allocation6 + $0x108] sm:$0xff] }
 0x24b   : > { %v1661_v26 = vadd.f32 %v1660_v16, %v1647_v22  ;;  %v4687_v16 = vld [vmem:[#allocation6 + $0x1b0] sm:$0xff]  ;;  %v4665_v22 = vld [vmem:[#allocation6 + $0x100] sm:$0xff] }
 0x24d   : > { %v1665_v30 = vmax.f32 %v1661_v26, 0.0  ;;  %v4695_v26 = vld [vmem:[#allocation6 + $0x1f0] sm:$0xff] }
 0x24e   : > { %v1634_v23 = vpop.f32.mrf.mxu3  ;;  %v1648_v25 = vpop.f32.mrf.mxu0 }
 0x24f   : > { %v1635_v24 = vadd.f32 %v1634_v23, %v1621_v21  ;;  %v4657_v21 = vld [vmem:[#allocation6 + $0xc0] sm:$0xff]  ;;  %v4696_v23 = vld [vmem:[#allocation6 + $0x1f8] sm:$0xff] }
 0x251   : > { %v1649_v27 = vadd.f32 %v1648_v25, %v1635_v24  ;;  %v1662_v28 = vpop.f32.mrf.mxu1  ;;  %v4678_v24 = vld [vmem:[#allocation6 + $0x168] sm:$0xff]  ;;  %v4685_v25 = vld [vmem:[#allocation6 + $0x1a0] sm:$0xff] }
 0x253   : > { %v1663_v29 = vadd.f32 %v1662_v28, %v1649_v27  ;;  %v4677_v27 = vld [vmem:[#allocation6 + $0x160] sm:$0xff]  ;;  %v4684_v28 = vld [vmem:[#allocation6 + $0x198] sm:$0xff] }
 0x255   : > { %v1666_v31 = vmax.f32 %v1663_v29, 0.0  ;;  %v4694_v29 = vld [vmem:[#allocation6 + $0x1e8] sm:$0xff] }
 0x257   : > { %v1667_v32 = vpack.c.bf16 %v1666_v31, %v1665_v30  ;;  %v4676_v30 = vld [vmem:[#allocation6 + $0x158] sm:$0xff]  ;;  %v4683_v31 = vld [vmem:[#allocation6 + $0x190] sm:$0xff] }
 0x259   : > { %1680 = vmatpush.bf16.msrb.mxu2 %v1667_v32  ;;  %1699 = vmatpush.bf16.msrb.mxu3 %v1667_v32 }
 0x25a   : > { %1718 = vmatpush.bf16.msrb.mxu0 %v1667_v32  ;;  %1794 = vmatpush.bf16.msra.mxu1 %v1667_v32 }
 0x25c   : > { %3943 = vmatmul.msk.bf16.vlgmr.msrb.gmra.mxu2 %vm1669_vm1, %v1668_v33  ;;  %3944 = vmatmul.msk.bf16.vlgmr.msrb.gmra.mxu3 %vm1669_vm1, %v1688_v34  ;;  %v4675_v33 = vld [vmem:[#allocation6 + $0x150] sm:$0xff]  ;;  %v4682_v34 = vld [vmem:[#allocation6 + $0x188] sm:$0xff] }
 0x25d   : > { %1737 = vmatpush.bf16.msra.mxu2 %v1667_v32  ;;  %1756 = vmatpush.bf16.msra.mxu3 %v1667_v32 }
 0x25e   : > { %1775 = vmatpush.bf16.msra.mxu0 %v1667_v32  ;;  %3949 = vmatmul.msk.bf16.vlgmr.msra.gmra.mxu1 %vm1669_vm1, %v1783_v36  ;;  %v4674_v36 = vld [vmem:[#allocation6 + $0x148] sm:$0xff] }
 0x25f   : > { %3945 = vmatmul.msk.bf16.vlgmr.msrb.gmra.mxu0 %vm1669_vm1, %v1707_v35  ;;  %2432 = vmatpush.bf16.msrb.mxu1 %v4648_v39  ;;  %v4692_v35 = vld [vmem:[#allocation6 + $0x1d8] sm:$0xff]  ;;  %v4673_v39 = vld [vmem:[#allocation6 + $0x140] sm:$0xff] }
 0x261   : > { %1813 = vmatpush.bf16.msrb.mxu2 %v1667_v32  ;;  %1832 = vmatpush.bf16.msrb.mxu3 %v1667_v32  ;;  %v4693_v32 = vld [vmem:[#allocation6 + $0x1e0] sm:$0xff] }
 0x262   : > { %2419 = vmatpush.bf16.msrb.mxu0 %v4640_v37  ;;  %v4681_v37 = vld [vmem:[#allocation6 + $0x180] sm:$0xff] }
 0x263   : > { %2433 = vmatpush.bf16.msrb.mxu1 %v4647_v40  ;;  %v4690_v40 = vld [vmem:[#allocation6 + $0x1c8] sm:$0xff] }
 0x266   : > { %2420 = vmatpush.bf16.msrb.mxu0 %v4639_v38  ;;  %v4691_v38 = vld [vmem:[#allocation6 + $0x1d0] sm:$0xff] }
 0x267   : > { %2434 = vmatpush.bf16.msrb.mxu1 %v4646_v42 }
 0x26a   : > { %2421 = vmatpush.bf16.msrb.mxu0 %v4638_v41 }
 0x26b   : > { %2435 = vmatpush.bf16.msrb.mxu1 %v4645_v50  ;;  %v4703_v50 = vld [vmem:[#allocation6 + $0x230] sm:$0xff] }
 0x26c   : > { %3946 = vmatmul.msk.bf16.vlgmr.msra.gmra.mxu2 %vm1669_vm1, %v1726_v44  ;;  %3947 = vmatmul.msk.bf16.vlgmr.msra.gmra.mxu3 %vm1669_vm1, %v1745_v46  ;;  %v4689_v46 = vld [vmem:[#allocation6 + $0x1c0] sm:$0xff] }
 0x26d   : > { %2445 = vmatpush.bf16.msra.mxu2 %v4656_v45  ;;  %2458 = vmatpush.bf16.msra.mxu3 %v4664_v47  ;;  %v4704_v45 = vld [vmem:[#allocation6 + $0x238] sm:$0xff] }
 0x26e   : > { %2422 = vmatpush.bf16.msrb.mxu0 %v4637_v43 }
 0x26f   : > { %3948 = vmatmul.msk.bf16.vlgmr.msra.gmra.mxu0 %vm1669_vm1, %v1764_v48  ;;  %2436 = vmatpush.bf16.msrb.mxu1 %v4644_v54  ;;  %v4702_v54 = vld [vmem:[#allocation6 + $0x228] sm:$0xff] }
 0x271   : > { %2446 = vmatpush.bf16.msra.mxu2 %v4655_v51  ;;  %2459 = vmatpush.bf16.msra.mxu3 %v4663_v52 }
 0x272   : > { %2423 = vmatpush.bf16.msrb.mxu0 %v4636_v49 }
 0x273   : > { %2437 = vmatpush.bf16.msrb.mxu1 %v4643_v58 }
 0x275   : > { %2447 = vmatpush.bf16.msra.mxu2 %v4654_v55  ;;  %2460 = vmatpush.bf16.msra.mxu3 %v4662_v56 }
 0x276   : > { %2424 = vmatpush.bf16.msrb.mxu0 %v4635_v53 }
 0x277   : > { %2438 = vmatpush.bf16.msrb.mxu1 %v4642_v62 }
 0x279   : > { %2448 = vmatpush.bf16.msra.mxu2 %v4653_v59  ;;  %2461 = vmatpush.bf16.msra.mxu3 %v4661_v60 }
 0x27a   : > { %2425 = vmatpush.bf16.msrb.mxu0 %v4634_v57  ;;  %v4701_v57 = vld [vmem:[#allocation6 + $0x220] sm:$0xff] }
 0x27b   : > { %2439 = vmatpush.bf16.msrb.mxu1 %v4641_v4 }
 0x27c   : > { %3950 = vmatmul.msk.bf16.vlgmr.msrb.gmra.mxu2 %vm1669_vm1, %v1802_v0  ;;  %3951 = vmatmul.msk.bf16.vlgmr.msrb.gmra.mxu3 %vm1669_vm1, %v1821_v2  ;;  %v4699_v2 = vld [vmem:[#allocation6 + $0x210] sm:$0xff] }
 0x27d   : > { %2449 = vmatpush.bf16.msra.mxu2 %v4652_v1  ;;  %2462 = vmatpush.bf16.msra.mxu3 %v4660_v3 }
 0x27e   : > { %2426 = vmatpush.bf16.msrb.mxu0 %v4633_v61 }
 0x27f   : > { %2484 = vmatpush.bf16.msra.mxu1 %v4680_v15 }
 0x281   : > { %2450 = vmatpush.bf16.msra.mxu2 %v4651_v6  ;;  %2463 = vmatpush.bf16.msra.mxu3 %v4659_v7  ;;  %v4697_v6 = vld [vmem:[#allocation6 + $0x200] sm:$0xff] }
 0x282   : > { %2471 = vmatpush.bf16.msra.mxu0 %v4672_v63  ;;  %v4700_v63 = vld [vmem:[#allocation6 + $0x218] sm:$0xff] }
 0x283   : > { %2485 = vmatpush.bf16.msra.mxu1 %v4679_v19  ;;  %v4864_v19 = vld [vmem:[#allocation10] ss:$0 sm:$0xff] }
 0x285   : > { %2451 = vmatpush.bf16.msra.mxu2 %v4650_v9  ;;  %2464 = vmatpush.bf16.msra.mxu3 %v4658_v17 }
 0x286   : > { %2472 = vmatpush.bf16.msra.mxu0 %v4671_v5  ;;  %v4698_v5 = vld [vmem:[#allocation6 + $0x208] sm:$0xff] }
 0x287   : > { %2486 = vmatpush.bf16.msra.mxu1 %v4678_v24 }
 0x289   : > { %2452 = vmatpush.bf16.msra.mxu2 %v4649_v11  ;;  %2465 = vmatpush.bf16.msra.mxu3 %v4657_v21 }
 0x28a   : > { %2473 = vmatpush.bf16.msra.mxu0 %v4670_v8 }
 0x28b   : > { %2487 = vmatpush.bf16.msra.mxu1 %v4677_v27 }
 0x28d   : > { %2497 = vmatpush.bf16.msrb.mxu2 %v4688_v12  ;;  %2510 = vmatpush.bf16.msrb.mxu3 %v4696_v23 }
 0x28e   : > { %2474 = vmatpush.bf16.msra.mxu0 %v4669_v10 }
 0x28f   : > { %2488 = vmatpush.bf16.msra.mxu1 %v4676_v30 }
 0x291   : > { %2498 = vmatpush.bf16.msrb.mxu2 %v4687_v16  ;;  %2511 = vmatpush.bf16.msrb.mxu3 %v4695_v26 }
 0x292   : > { %2475 = vmatpush.bf16.msra.mxu0 %v4668_v13 }
 0x293   : > { %2489 = vmatpush.bf16.msra.mxu1 %v4675_v33 }
 0x295   : > { %2499 = vmatpush.bf16.msrb.mxu2 %v4686_v20  ;;  %2512 = vmatpush.bf16.msrb.mxu3 %v4694_v29 }
 0x296   : > { %2476 = vmatpush.bf16.msra.mxu0 %v4667_v14 }
 0x297   : > { %2490 = vmatpush.bf16.msra.mxu1 %v4674_v36 }
 0x299   : > { %2500 = vmatpush.bf16.msrb.mxu2 %v4685_v25  ;;  %2513 = vmatpush.bf16.msrb.mxu3 %v4693_v32 }
 0x29a   : > { %2477 = vmatpush.bf16.msra.mxu0 %v4666_v18 }
 0x29b   : > { %2491 = vmatpush.bf16.msra.mxu1 %v4673_v39 }
 0x29d   : > { %2501 = vmatpush.bf16.msrb.mxu2 %v4684_v28  ;;  %2514 = vmatpush.bf16.msrb.mxu3 %v4692_v35 }
 0x29e   : > { %2478 = vmatpush.bf16.msra.mxu0 %v4665_v22 }
 0x2a1   : > { %2502 = vmatpush.bf16.msrb.mxu2 %v4683_v31  ;;  %2515 = vmatpush.bf16.msrb.mxu3 %v4691_v38 }
 0x2a5   : > { %2503 = vmatpush.bf16.msrb.mxu2 %v4682_v34  ;;  %2516 = vmatpush.bf16.msrb.mxu3 %v4690_v40 }
 0x2a9   : > { %2504 = vmatpush.bf16.msrb.mxu2 %v4681_v37  ;;  %2517 = vmatpush.bf16.msrb.mxu3 %v4689_v46  ;;  %v2581_v46 = vld [vmem:[#allocation4 + $0x2] sm:$0x1] }
 0x2db   : > { %v1796_v43 = vpop.f32.mrf.mxu1 }
 0x2dc   : > { %v1720_v41 = vpop.f32.mrf.mxu0  ;;  %v1800_v56 = vpack.c.bf16 %v1796_v43, %v1796_v43 }
 0x2dd   : > { %v1724_v42 = vpack.c.bf16 %v1720_v41, %v1720_v41 }
 0x2df   : > { %2453 = vmatmul.bf16.vlgmr.msra.gmra.mxu2 %v1724_v42  ;;  %v1682_v44 = vpop.f32.mrf.mxu2  ;;  %v1701_v48 = vpop.f32.mrf.mxu3 }
 0x2e0   : > { %v1686_v47 = vpack.c.bf16 %v1682_v44, %v1682_v44  ;;  %v1705_v49 = vpack.c.bf16 %v1701_v48, %v1701_v48  ;;  %v2538_v44 = vld [vmem:[#allocation4] sm:$0x1]  ;;  %v4712_v48 = vld [vmem:[#allocation7 + $0x38] sm:$0xff] }
 0x2e2   : > { %2427 = vmatmul.bf16.vlgmr.msrb.gmra.mxu0 %v1686_v47  ;;  %2440 = vmatmul.bf16.vlgmr.msrb.gmra.mxu1 %v1705_v49  ;;  %v2657_v47 = vld [vmem:[#allocation4 + $0x6] sm:$0x1]  ;;  %v4711_v49 = vld [vmem:[#allocation7 + $0x30] sm:$0xff] }
 0x2e3   : > { %2523 = vmatpush.bf16.msrb.mxu0 %v4704_v45  ;;  %v1798_v52 = vpop.f32.mrf.mxu1  ;;  %v2562_v45 = vld [vmem:[#allocation4 + $0x1] sm:$0x1] }
 0x2e4   : > { %v1722_v51 = vpop.f32.mrf.mxu0  ;;  %v4710_v52 = vld [vmem:[#allocation7 + $0x28] sm:$0xff] }
 0x2e5   : > { %v4719_v51 = vld [vmem:[#allocation7 + $0x70] sm:$0xff] }
 0x2e7   : > { %v1684_v53 = vpop.f32.mrf.mxu2  ;;  %2524 = vmatpush.bf16.msrb.mxu0 %v4703_v50  ;;  %v1703_v55 = vpop.f32.mrf.mxu3  ;;  %v4720_v50 = vld [vmem:[#allocation7 + $0x78] sm:$0xff] }
 0x2e8   : > { %v4718_v53 = vld [vmem:[#allocation7 + $0x68] sm:$0xff]  ;;  %v2600_v55 = vld [vmem:[#allocation4 + $0x3] sm:$0x1] }
 0x2eb   : > { %2525 = vmatpush.bf16.msrb.mxu0 %v4702_v54  ;;  %v4709_v54 = vld [vmem:[#allocation7 + $0x20] sm:$0xff] }
 0x2ec   : > { %v1777_v58 = vpop.f32.mrf.mxu0 }
 0x2ed   : > { %v1781_v60 = vpack.c.bf16 %v1777_v58, %v1777_v58  ;;  %v4736_v58 = vld [vmem:[#allocation7 + $0xf8] sm:$0xff] }
 0x2ef   : > { %2505 = vmatmul.bf16.vlgmr.msrb.gmra.mxu2 %v1800_v56  ;;  %v1739_v59 = vpop.f32.mrf.mxu2  ;;  %2526 = vmatpush.bf16.msrb.mxu0 %v4701_v57  ;;  %v1758_v62 = vpop.f32.mrf.mxu3  ;;  %v4728_v56 = vld [vmem:[#allocation7 + $0xb8] sm:$0xff] }
 0x2f0   : > { %v1743_v61 = vpack.c.bf16 %v1739_v59, %v1739_v59  ;;  %v1762_v0 = vpack.c.bf16 %v1758_v62, %v1758_v62  ;;  %v2619_v57 = vld [vmem:[#allocation4 + $0x4] sm:$0x1]  ;;  %v2638_v59 = vld [vmem:[#allocation4 + $0x5] sm:$0x1]  ;;  %v4727_v62 = vld [vmem:[#allocation7 + $0xb0] sm:$0xff] }
 0x2f2   : > { %2466 = vmatmul.bf16.vlgmr.msra.gmra.mxu3 %v1743_v61  ;;  %2479 = vmatmul.bf16.vlgmr.msra.gmra.mxu0 %v1762_v0  ;;  %v4717_v61 = vld [vmem:[#allocation7 + $0x60] sm:$0xff]  ;;  %v4707_v0 = vld [vmem:[#allocation7 + $0x10] sm:$0xff] }
 0x2f3   : > { %2492 = vmatmul.bf16.vlgmr.msra.gmra.mxu1 %v1781_v60  ;;  %2527 = vmatpush.bf16.msrb.mxu0 %v4700_v63  ;;  %v4708_v60 = vld [vmem:[#allocation7 + $0x18] sm:$0xff]  ;;  %v4735_v63 = vld [vmem:[#allocation7 + $0xf0] sm:$0xff] }
 0x2f4   : > { %v1779_v1 = vpop.f32.mrf.mxu0 }
 0x2f5   : > { %v4716_v1 = vld [vmem:[#allocation7 + $0x58] sm:$0xff] }
 0x2f7   : > { %v1741_v3 = vpop.f32.mrf.mxu2  ;;  %v1760_v4 = vpop.f32.mrf.mxu3  ;;  %2528 = vmatpush.bf16.msrb.mxu0 %v4699_v2  ;;  %v4726_v2 = vld [vmem:[#allocation7 + $0xa8] sm:$0xff] }
 0x2f8   : > { %v4734_v3 = vld [vmem:[#allocation7 + $0xe8] sm:$0xff] }
 0x2f9   : > { %v4706_v4 = vld [vmem:[#allocation7 + $0x8] sm:$0xff] }
 0x2fb   : > { %2529 = vmatpush.bf16.msrb.mxu0 %v4698_v5  ;;  %v4715_v5 = vld [vmem:[#allocation7 + $0x50] sm:$0xff] }
 0x2ff   : > { %v1815_v7 = vpop.f32.mrf.mxu2  ;;  %v1834_v9 = vpop.f32.mrf.mxu3  ;;  %2530 = vmatpush.bf16.msrb.mxu0 %v4697_v6  ;;  %v4725_v6 = vld [vmem:[#allocation7 + $0xa0] sm:$0xff] }
 0x300   : > { %v1819_v8 = vpack.c.bf16 %v1815_v7, %v1815_v7  ;;  %v1838_v10 = vpack.c.bf16 %v1834_v9, %v1834_v9  ;;  %v4733_v7 = vld [vmem:[#allocation7 + $0xe0] sm:$0xff]  ;;  %v4714_v9 = vld [vmem:[#allocation7 + $0x48] sm:$0xff] }
 0x302   : > { %2518 = vmatmul.bf16.vlgmr.msrb.gmra.mxu3 %v1819_v8  ;;  %2531 = vmatmul.bf16.vlgmr.msrb.gmra.mxu0 %v1838_v10  ;;  %v4705_v8 = vld [vmem:[#allocation7] sm:$0xff]  ;;  %v4744_v10 = vld [vmem:[#allocation7 + $0x138] sm:$0xff] }
 0x307   : > { %v1817_v11 = vpop.f32.mrf.mxu2  ;;  %v1836_v12 = vpop.f32.mrf.mxu3 }
 0x308   : > { %v2676_v11 = vld [vmem:[#allocation4 + $0x7] sm:$0x1] }
 0x309   : > { %v4724_v12 = vld [vmem:[#allocation7 + $0x98] sm:$0xff] }
 0x35f   : > { %v2428_v13 = vpop.f32.mrf.mxu0  ;;  %v2441_v14 = vpop.f32.mrf.mxu1 }
 0x360   : > { %v2429_v20 = vadd.f32 %v4864_v19, %v2428_v13  ;;  %v2695_v13 = vld [vmem:[#allocation4 + $0x8] sm:$0x1]  ;;  %v4722_v19 = vld [vmem:[#allocation7 + $0x88] sm:$0xff] }
 0x362   : > { %v2454_v15 = vpop.f32.mrf.mxu2  ;;  %v2442_v24 = vadd.f32 %v2441_v14, %v2429_v20  ;;  %v4732_v14 = vld [vmem:[#allocation7 + $0xd8] sm:$0xff]  ;;  %v4730_v20 = vld [vmem:[#allocation7 + $0xc8] sm:$0xff] }
 0x364   : > { %v2455_v26 = vadd.f32 %v2454_v15, %v2442_v24  ;;  %v4743_v15 = vld [vmem:[#allocation7 + $0x130] sm:$0xff] }
 0x365   : > { %v4739_v24 = vld [vmem:[#allocation7 + $0x110] sm:$0xff] }
 0x367   : > { %v2430_v16 = vpop.f32.mrf.mxu0  ;;  %v2443_v17 = vpop.f32.mrf.mxu1 }
 0x368   : > { %v4723_v16 = vld [vmem:[#allocation7 + $0x90] sm:$0xff] }
 0x369   : > { %v4731_v17 = vld [vmem:[#allocation7 + $0xd0] sm:$0xff] }
 0x36a   : > { %v2456_v18 = vpop.f32.mrf.mxu2 }
 0x36b   : > { %v4742_v18 = vld [vmem:[#allocation7 + $0x128] sm:$0xff] }
 0x36f   : > { %v2480_v21 = vpop.f32.mrf.mxu0 }
 0x370   : > { %v2493_v22 = vpop.f32.mrf.mxu1 }
 0x372   : > { %v2506_v23 = vpop.f32.mrf.mxu2 }
 0x375   : > { %v2467_v25 = vpop.f32.mrf.mxu3 }
 0x376   : > { %v2468_v27 = vadd.f32 %v2467_v25, %v2455_v26  ;;  %v4752_v25 = vld [vmem:[#allocation7 + $0x178] sm:$0xff]  ;;  %v4721_v26 = vld [vmem:[#allocation7 + $0x80] sm:$0xff] }
 0x377   : > { %v2482_v28 = vpop.f32.mrf.mxu0 }
 0x378   : > { %v2495_v29 = vpop.f32.mrf.mxu1  ;;  %v2481_v31 = vadd.f32 %v2480_v21, %v2468_v27  ;;  %v4741_v21 = vld [vmem:[#allocation7 + $0x120] sm:$0xff]  ;;  %v4760_v28 = vld [vmem:[#allocation7 + $0x1b8] sm:$0xff] }
 0x379   : > { %v4729_v27 = vld [vmem:[#allocation7 + $0xc0] sm:$0xff]  ;;  %v4768_v29 = vld [vmem:[#allocation7 + $0x1f8] sm:$0xff] }
 0x37a   : > { %v2508_v30 = vpop.f32.mrf.mxu2  ;;  %v2494_v33 = vadd.f32 %v2493_v22, %v2481_v31  ;;  %v4740_v22 = vld [vmem:[#allocation7 + $0x118] sm:$0xff]  ;;  %v4751_v31 = vld [vmem:[#allocation7 + $0x170] sm:$0xff] }
 0x37b   : > { %v4738_v30 = vld [vmem:[#allocation7 + $0x108] sm:$0xff] }
 0x37c   : > { %v2507_v35 = vadd.f32 %v2506_v23, %v2494_v33  ;;  %v4713_v23 = vld [vmem:[#allocation7 + $0x40] sm:$0xff]  ;;  %v4767_v33 = vld [vmem:[#allocation7 + $0x1f0] sm:$0xff] }
 0x37d   : > { %v2469_v32 = vpop.f32.mrf.mxu3 }
 0x37e   : > { %v4759_v32 = vld [vmem:[#allocation7 + $0x1b0] sm:$0xff] }
 0x37f   : > { %v2532_v34 = vpop.f32.mrf.mxu0 }
 0x385   : > { %v2519_v36 = vpop.f32.mrf.mxu3 }
 0x386   : > { %v2520_v37 = vadd.f32 %v2519_v36, %v2507_v35  ;;  %v4750_v35 = vld [vmem:[#allocation7 + $0x168] sm:$0xff] }
 0x387   : > { %v2534_v39 = vpop.f32.mrf.mxu0  ;;  %v4758_v36 = vld [vmem:[#allocation7 + $0x1a8] sm:$0xff] }
 0x388   : > { %v2533_v38 = vadd.f32 %v2532_v34, %v2520_v37  ;;  %v4737_v34 = vld [vmem:[#allocation7 + $0x100] sm:$0xff]  ;;  %v4766_v37 = vld [vmem:[#allocation7 + $0x1e8] sm:$0xff] }
 0x389   : > { %v4757_v39 = vld [vmem:[#allocation7 + $0x1a0] sm:$0xff] }
 0x38a   : > { %v2536_v40 = vmax.f32 %v2533_v38, 0.0  ;;  %v4749_v38 = vld [vmem:[#allocation7 + $0x160] sm:$0xff] }
 0x38c   : > { %v2537_v41 = vpack.c.bf16 %v2536_v40, %v2536_v40  ;;  %v4765_v40 = vld [vmem:[#allocation7 + $0x1e0] sm:$0xff] }
 0x38d   : > { %v2521_v42 = vpop.f32.mrf.mxu3 }
 0x38e   : > { %v2545_v43 = vsel %vm2543_vm2, %v2537_v41, 0  ;;  %v4748_v41 = vld [vmem:[#allocation7 + $0x158] sm:$0xff] }
 0x38f   : > { %2554 = vmatpush.bf16.msrb.mxu1 %v2545_v43  ;;  %2573 = vmatpush.bf16.msra.mxu2 %v2545_v43  ;;  %v4756_v42 = vld [vmem:[#allocation7 + $0x198] sm:$0xff] }
 0x390   : > { %2592 = vmatpush.bf16.msra.mxu3 %v2545_v43  ;;  %2668 = vmatpush.bf16.msra.mxu0 %v2545_v43 }
 0x392   : > { %4240 = vmatmul.msk.bf16.vlgmr.msrb.gmra.mxu1 %vm2539_vm3, %v2538_v44  ;;  %4241 = vmatmul.msk.bf16.vlgmr.msra.gmra.mxu2 %vm2539_vm3, %v2562_v45  ;;  %v4747_v44 = vld [vmem:[#allocation7 + $0x150] sm:$0xff] }
 0x393   : > { %2611 = vmatpush.bf16.msra.mxu1 %v2545_v43  ;;  %2630 = vmatpush.bf16.msrb.mxu2 %v2545_v43  ;;  %v4755_v45 = vld [vmem:[#allocation7 + $0x190] sm:$0xff] }
 0x394   : > { %2649 = vmatpush.bf16.msrb.mxu3 %v2545_v43  ;;  %4246 = vmatmul.msk.bf16.vlgmr.msra.gmra.mxu0 %vm2539_vm3, %v2657_v47  ;;  %v4746_v47 = vld [vmem:[#allocation7 + $0x148] sm:$0xff] }
 0x395   : > { %4242 = vmatmul.msk.bf16.vlgmr.msra.gmra.mxu3 %vm2539_vm3, %v2581_v46  ;;  %3303 = vmatpush.bf16.msrb.mxu0 %v4720_v50  ;;  %v4763_v46 = vld [vmem:[#allocation7 + $0x1d0] sm:$0xff]  ;;  %v4745_v50 = vld [vmem:[#allocation7 + $0x140] sm:$0xff] }
 0x397   : > { %2687 = vmatpush.bf16.msrb.mxu1 %v2545_v43  ;;  %2706 = vmatpush.bf16.msra.mxu2 %v2545_v43  ;;  %v4764_v43 = vld [vmem:[#allocation7 + $0x1d8] sm:$0xff] }
 0x398   : > { %3290 = vmatpush.bf16.msra.mxu3 %v4712_v48  ;;  %v4754_v48 = vld [vmem:[#allocation7 + $0x188] sm:$0xff] }
 0x399   : > { %3304 = vmatpush.bf16.msrb.mxu0 %v4719_v51 }
 0x39c   : > { %3291 = vmatpush.bf16.msra.mxu3 %v4711_v49  ;;  %v4762_v49 = vld [vmem:[#allocation7 + $0x1c8] sm:$0xff] }
 0x39d   : > { %3305 = vmatpush.bf16.msrb.mxu0 %v4718_v53  ;;  %v4753_v53 = vld [vmem:[#allocation7 + $0x180] sm:$0xff] }
 0x3a0   : > { %3292 = vmatpush.bf16.msra.mxu3 %v4710_v52  ;;  %v4776_v52 = vld [vmem:[#allocation7 + $0x238] sm:$0xff] }
 0x3a1   : > { %3306 = vmatpush.bf16.msrb.mxu0 %v4717_v61 }
 0x3a2   : > { %4243 = vmatmul.msk.bf16.vlgmr.msra.gmra.mxu1 %vm2539_vm3, %v2600_v55  ;;  %4244 = vmatmul.msk.bf16.vlgmr.msrb.gmra.mxu2 %vm2539_vm3, %v2619_v57  ;;  %v4775_v57 = vld [vmem:[#allocation7 + $0x230] sm:$0xff] }
 0x3a3   : > { %3316 = vmatpush.bf16.msra.mxu1 %v4728_v56  ;;  %3329 = vmatpush.bf16.msrb.mxu2 %v4736_v58 }
 0x3a4   : > { %3293 = vmatpush.bf16.msra.mxu3 %v4709_v54  ;;  %v4761_v54 = vld [vmem:[#allocation7 + $0x1c0] sm:$0xff] }
 0x3a5   : > { %4245 = vmatmul.msk.bf16.vlgmr.msrb.gmra.mxu3 %vm2539_vm3, %v2638_v59  ;;  %3307 = vmatpush.bf16.msrb.mxu0 %v4716_v1  ;;  %v4773_v1 = vld [vmem:[#allocation7 + $0x220] sm:$0xff] }
 0x3a7   : > { %3317 = vmatpush.bf16.msra.mxu1 %v4727_v62  ;;  %3330 = vmatpush.bf16.msrb.mxu2 %v4735_v63  ;;  %v4774_v62 = vld [vmem:[#allocation7 + $0x228] sm:$0xff] }
 0x3a8   : > { %3294 = vmatpush.bf16.msra.mxu3 %v4708_v60 }
 0x3a9   : > { %3308 = vmatpush.bf16.msrb.mxu0 %v4715_v5  ;;  %v4772_v5 = vld [vmem:[#allocation7 + $0x218] sm:$0xff] }
 0x3ab   : > { %3318 = vmatpush.bf16.msra.mxu1 %v4726_v2  ;;  %3331 = vmatpush.bf16.msrb.mxu2 %v4734_v3 }
 0x3ac   : > { %3295 = vmatpush.bf16.msra.mxu3 %v4707_v0 }
 0x3ad   : > { %3309 = vmatpush.bf16.msrb.mxu0 %v4714_v9 }
 0x3af   : > { %3319 = vmatpush.bf16.msra.mxu1 %v4725_v6  ;;  %3332 = vmatpush.bf16.msrb.mxu2 %v4733_v7  ;;  %v4771_v7 = vld [vmem:[#allocation7 + $0x210] sm:$0xff] }
 0x3b0   : > { %3296 = vmatpush.bf16.msra.mxu3 %v4706_v4 }
 0x3b1   : > { %3310 = vmatpush.bf16.msrb.mxu0 %v4713_v23 }
 0x3b2   : > { %4247 = vmatmul.msk.bf16.vlgmr.msrb.gmra.mxu1 %vm2539_vm3, %v2676_v11  ;;  %4248 = vmatmul.msk.bf16.vlgmr.msra.gmra.mxu2 %vm2539_vm3, %v2695_v13  ;;  %v4770_v13 = vld [vmem:[#allocation7 + $0x208] sm:$0xff] }
 0x3b3   : > { %3320 = vmatpush.bf16.msra.mxu1 %v4724_v12  ;;  %3333 = vmatpush.bf16.msrb.mxu2 %v4732_v14 }
 0x3b4   : > { %3297 = vmatpush.bf16.msra.mxu3 %v4705_v8 }
 0x3b5   : > { %3355 = vmatpush.bf16.msra.mxu0 %v4752_v25 }
 0x3b7   : > { %3321 = vmatpush.bf16.msra.mxu1 %v4723_v16  ;;  %3334 = vmatpush.bf16.msrb.mxu2 %v4731_v17 }
 0x3b8   : > { %3342 = vmatpush.bf16.msrb.mxu3 %v4744_v10 }
 0x3b9   : > { %3356 = vmatpush.bf16.msra.mxu0 %v4751_v31 }
 0x3bb   : > { %3322 = vmatpush.bf16.msra.mxu1 %v4722_v19  ;;  %3335 = vmatpush.bf16.msrb.mxu2 %v4730_v20 }
 0x3bc   : > { %3343 = vmatpush.bf16.msrb.mxu3 %v4743_v15  ;;  %v4769_v15 = vld [vmem:[#allocation7 + $0x200] sm:$0xff] }
 0x3bd   : > { %3357 = vmatpush.bf16.msra.mxu0 %v4750_v35 }
 0x3bf   : > { %3323 = vmatpush.bf16.msra.mxu1 %v4721_v26  ;;  %3336 = vmatpush.bf16.msrb.mxu2 %v4729_v27 }
 0x3c0   : > { %3344 = vmatpush.bf16.msrb.mxu3 %v4742_v18 }
 0x3c1   : > { %3358 = vmatpush.bf16.msra.mxu0 %v4749_v38 }
 0x3c3   : > { %3368 = vmatpush.bf16.msrb.mxu1 %v4760_v28  ;;  %3381 = vmatpush.bf16.msra.mxu2 %v4768_v29 }
 0x3c4   : > { %3345 = vmatpush.bf16.msrb.mxu3 %v4741_v21 }
 0x3c5   : > { %3359 = vmatpush.bf16.msra.mxu0 %v4748_v41 }
 0x3c7   : > { %3369 = vmatpush.bf16.msrb.mxu1 %v4759_v32  ;;  %3382 = vmatpush.bf16.msra.mxu2 %v4767_v33 }
 0x3c8   : > { %3346 = vmatpush.bf16.msrb.mxu3 %v4740_v22 }
 0x3c9   : > { %3360 = vmatpush.bf16.msra.mxu0 %v4747_v44 }
 0x3cb   : > { %3370 = vmatpush.bf16.msrb.mxu1 %v4758_v36  ;;  %3383 = vmatpush.bf16.msra.mxu2 %v4766_v37 }
 0x3cc   : > { %3347 = vmatpush.bf16.msrb.mxu3 %v4739_v24 }
 0x3cd   : > { %3361 = vmatpush.bf16.msra.mxu0 %v4746_v47 }
 0x3cf   : > { %3371 = vmatpush.bf16.msrb.mxu1 %v4757_v39  ;;  %3384 = vmatpush.bf16.msra.mxu2 %v4765_v40 }
 0x3d0   : > { %3348 = vmatpush.bf16.msrb.mxu3 %v4738_v30  ;;  %v2857_v30 = vld [vmem:[#allocation12] sm:$0x1] }
 0x3d1   : > { %3362 = vmatpush.bf16.msra.mxu0 %v4745_v50 }
 0x3d3   : > { %3372 = vmatpush.bf16.msrb.mxu1 %v4756_v42  ;;  %3385 = vmatpush.bf16.msra.mxu2 %v4764_v43 }
 0x3d4   : > { %3349 = vmatpush.bf16.msrb.mxu3 %v4737_v34 }
 0x3d7   : > { %3373 = vmatpush.bf16.msrb.mxu1 %v4755_v45  ;;  %3386 = vmatpush.bf16.msra.mxu2 %v4763_v46 }
 0x3db   : > { %3374 = vmatpush.bf16.msrb.mxu1 %v4754_v48  ;;  %3387 = vmatpush.bf16.msra.mxu2 %v4762_v49 }
 0x3df   : > { %3375 = vmatpush.bf16.msrb.mxu1 %v4753_v53  ;;  %3388 = vmatpush.bf16.msra.mxu2 %v4761_v54 }
 0x40f   : > { %v2556_v51 = vpop.f32.mrf.mxu1 }
 0x410   : > { %v2560_v55 = vpack.c.bf16 %v2556_v51, %v2556_v51 }
 0x411   : > { %v2670_v56 = vpop.f32.mrf.mxu0 }
 0x412   : > { %3298 = vmatmul.bf16.vlgmr.msra.gmra.mxu3 %v2560_v55  ;;  %v2674_v9 = vpack.c.bf16 %v2670_v56, %v2670_v56 }
 0x413   : > { %3394 = vmatpush.bf16.msra.mxu3 %v4776_v52 }
 0x415   : > { %v2575_v58 = vpop.f32.mrf.mxu2 }
 0x416   : > { %v2579_v59 = vpack.c.bf16 %v2575_v58, %v2575_v58 }
 0x417   : > { %v2558_v60 = vpop.f32.mrf.mxu1  ;;  %3395 = vmatpush.bf16.msra.mxu3 %v4775_v57 }
 0x418   : > { %v2594_v61 = vpop.f32.mrf.mxu3  ;;  %3311 = vmatmul.bf16.vlgmr.msrb.gmra.mxu0 %v2579_v59 }
 0x419   : > { %v2598_v63 = vpack.c.bf16 %v2594_v61, %v2594_v61  ;;  %v2672_v0 = vpop.f32.mrf.mxu0 }
 0x41b   : > { %3324 = vmatmul.bf16.vlgmr.msra.gmra.mxu1 %v2598_v63  ;;  %3396 = vmatpush.bf16.msra.mxu3 %v4774_v62 }
 0x41d   : > { %v2577_v2 = vpop.f32.mrf.mxu2 }
 0x41f   : > { %v2613_v3 = vpop.f32.mrf.mxu1  ;;  %3397 = vmatpush.bf16.msra.mxu3 %v4773_v1 }
 0x420   : > { %v2596_v4 = vpop.f32.mrf.mxu3  ;;  %v2617_v6 = vpack.c.bf16 %v2613_v3, %v2613_v3 }
 0x422   : > { %3337 = vmatmul.bf16.vlgmr.msrb.gmra.mxu2 %v2617_v6 }
 0x423   : > { %3398 = vmatpush.bf16.msra.mxu3 %v4772_v5 }
 0x425   : > { %v2632_v8 = vpop.f32.mrf.mxu2 }
 0x426   : > { %v2636_v10 = vpack.c.bf16 %v2632_v8, %v2632_v8 }
 0x427   : > { %v2615_v11 = vpop.f32.mrf.mxu1  ;;  %3399 = vmatpush.bf16.msra.mxu3 %v4771_v7 }
 0x428   : > { %v2651_v12 = vpop.f32.mrf.mxu3  ;;  %3350 = vmatmul.bf16.vlgmr.msrb.gmra.mxu3 %v2636_v10 }
 0x429   : > { %v2655_v14 = vpack.c.bf16 %v2651_v12, %v2651_v12 }
 0x42b   : > { %3363 = vmatmul.bf16.vlgmr.msra.gmra.mxu0 %v2655_v14  ;;  %3376 = vmatmul.bf16.vlgmr.msrb.gmra.mxu1 %v2674_v9 }
 0x42c   : > { %3400 = vmatpush.bf16.msra.mxu3 %v4770_v13 }
 0x42d   : > { %v2634_v16 = vpop.f32.mrf.mxu2 }
 0x42f   : > { %v2689_v17 = vpop.f32.mrf.mxu1 }
 0x430   : > { %3401 = vmatpush.bf16.msra.mxu3 %v4769_v15  ;;  %v2653_v18 = vpop.f32.mrf.mxu3  ;;  %v2693_v19 = vpack.c.bf16 %v2689_v17, %v2689_v17 }
 0x432   : > { %3389 = vmatmul.bf16.vlgmr.msra.gmra.mxu2 %v2693_v19 }
 0x435   : > { %v2708_v20 = vpop.f32.mrf.mxu2 }
 0x436   : > { %v2712_v21 = vpack.c.bf16 %v2708_v20, %v2708_v20 }
 0x437   : > { %v2691_v22 = vpop.f32.mrf.mxu1 }
 0x438   : > { %3402 = vmatmul.bf16.vlgmr.msra.gmra.mxu3 %v2712_v21 }
 0x43d   : > { %v2710_v23 = vpop.f32.mrf.mxu2 }
 0x495   : > { %v3299_v24 = vpop.f32.mrf.mxu3  ;;  %v3312_v25 = vpop.f32.mrf.mxu0 }
 0x496   : > { %v3300_v31 = vadd.f32 %v3299_v24, %v2857_v30 }
 0x498   : > { %v3325_v26 = vpop.f32.mrf.mxu1  ;;  %v3313_v35 = vadd.f32 %v3312_v25, %v3300_v31 }
 0x49a   : > { %v3326_v37 = vadd.f32 %v3325_v26, %v3313_v35 }
 0x49d   : > { %v3301_v27 = vpop.f32.mrf.mxu3  ;;  %v3314_v28 = vpop.f32.mrf.mxu0 }
 0x4a0   : > { %v3327_v29 = vpop.f32.mrf.mxu1 }
 0x4a5   : > { %v3338_v32 = vpop.f32.mrf.mxu2 }
 0x4a6   : > { %v3339_v39 = vadd.f32 %v3338_v32, %v3326_v37 }
 0x4a8   : > { %v3364_v33 = vpop.f32.mrf.mxu0  ;;  %v3377_v34 = vpop.f32.mrf.mxu1 }
 0x4ab   : > { %v3351_v36 = vpop.f32.mrf.mxu3 }
 0x4ac   : > { %v3352_v42 = vadd.f32 %v3351_v36, %v3339_v39 }
 0x4ad   : > { %v3340_v38 = vpop.f32.mrf.mxu2 }
 0x4ae   : > { %v3365_v44 = vadd.f32 %v3364_v33, %v3352_v42 }
 0x4b0   : > { %v3366_v40 = vpop.f32.mrf.mxu0  ;;  %v3379_v41 = vpop.f32.mrf.mxu1  ;;  %v3378_v46 = vadd.f32 %v3377_v34, %v3365_v44 }
 0x4b3   : > { %v3353_v43 = vpop.f32.mrf.mxu3 }
 0x4b5   : > { %v3390_v45 = vpop.f32.mrf.mxu2 }
 0x4b6   : > { %v3391_v47 = vadd.f32 %v3390_v45, %v3378_v46 }
 0x4bb   : > { %v3403_v48 = vpop.f32.mrf.mxu3 }
 0x4bc   : > { %v3404_v49 = vadd.f32 %v3403_v48, %v3391_v47 }
 0x4bd   : > { %v3392_v50 = vpop.f32.mrf.mxu2 }
 0x4be   : > { %v3407_v51 = vmax.f32 %v3404_v49, 0.0 }
 0x4c0   : > { %3408 = vst [vmem:[%s519_s17] sm:$0x1] %v3407_v51 }
 0x4c3   : > { %v3405_v52 = vpop.f32.mrf.mxu3 }
 0x4c4 PF: > { %s26_s21 = sadd.s32 1, %s5097_s21  }
 0x4c5   : > { %p23_p7 = scmp.ge.s32.totalorder %s26_s21, 4  }
 0x4c7   :  { %25 = sbr.rel (!%p23_p7) target bundleno = 8 (0x8), region = 151 }
 0x4cc   :  { %3426 = vsyncpa [#allocation3], 1 }
 0x4cd   :  { %3428 = vsyncpa [#allocation3 + $0x1], 1 }
 0x4ce   :  { %3429 = vsyncpa [#allocation5], 1 }
 0x4cf   :  { %3430 = vsyncpa [#allocation8], 1 }
 0x4d0   :  { %3431 = vsyncpa [#allocation11], 1 }

</bundles_post_ra>
